<compile_context>
chip_gen: v5e
topology: v5e:2x2
jax: 0.10.0
libtpu: 0.0.40
codegen_flags: <defaults>
</compile_context>

<pallas_src>
import math
import functools

import numpy as np
import jax
import jax.numpy as jnp
from jax import lax
from jax.experimental import pallas as pl
from jax.experimental.pallas import tpu as pltpu

# ----------------------------- config ------------------------------------- #
D_MODEL = 32
MULTI_HEADS = 4
NUM_LAYERS_DECODER = 2
FILTER_SIZES = (2, 3, 4)
SEQ_LEN = 8
BATCH = 2
DK = D_MODEL // MULTI_HEADS
LN_EPS = 1e-5


# --------------------------- fused decoder kernel -------------------------- #
def _fused_decoder_kernel(x_ref, attn_ref, wc_ref, wf1_ref, wres_ref,
                          const_ref, conv_ref, wlin_ref, out_ref, *,
                          num_layers, heads, batch, seq_len, d_model,
                          n_filters, max_k):
    f32 = jnp.float32
    S, D, B, H = seq_len, d_model, batch, heads
    BS = B * S
    inv_n = 1.0 / float(S * D)
    dims_nt = (((1,), (1,)), ((), ()))        # contract last dims of both (A @ B^T)

    xf = x_ref[...]                           # (BS, D) running activation
    cst = const_ref[...]                      # ((max_k + 1 + H) * BS, BS)
    shift_stack = cst[0:max_k * BS, :]        # (max_k*BS, BS) window shift matrices
    sel = cst[max_k * BS:(max_k + 1) * BS, :] # (BS, BS) same-batch 0/1 selector
    attn_mask = cst[(max_k + 1) * BS:, :]     # (H*BS, BS) cross-batch -> -1e30

    def layer_norm(z):
        # LayerNorm over each batch's [S, D] slab, vectorized over the whole
        # (BS, D) slab: per-batch sums via one 0/1 selector matmul on the MXU,
        # then one lane reduction each for sum and sum-of-squares.
        s1 = jnp.sum(jnp.dot(sel, z, preferred_element_type=f32),
                     axis=-1, keepdims=True)
        s2 = jnp.sum(jnp.dot(sel, z * z, preferred_element_type=f32),
                     axis=-1, keepdims=True)
        mean = s1 * inv_n
        var = s2 * inv_n - mean * mean
        return (z - mean) * lax.rsqrt(var + LN_EPS)

    for l in range(num_layers):               # static unroll (L = 2)
        # ---- multi-head attention, reassociated: zero dk-wide lane slices ---- #
        xa = [jnp.dot(xf, attn_ref[(l * 2 + 0) * H + h], preferred_element_type=f32)
              for h in range(H)]              # x @ A_h   (BS, D)
        xb = [jnp.dot(xf, attn_ref[(l * 2 + 1) * H + h], preferred_element_type=f32)
              for h in range(H)]              # x @ B_h   (BS, D)
        scores = jnp.concatenate(
            [lax.dot_general(xa[h], xf, dims_nt, preferred_element_type=f32)
             for h in range(H)], axis=0) + attn_mask                 # (H*BS, BS)
        m = jnp.max(scores, axis=-1, keepdims=True)
        e = jnp.exp(scores - m)
        p = e * pl.reciprocal(jnp.sum(e, axis=-1, keepdims=True), approx=True)
        ma = jnp.dot(p[0:BS, :], xb[0], preferred_element_type=f32)
        for h in range(1, H):
            ma = ma + jnp.dot(p[h * BS:(h + 1) * BS, :], xb[h],
                              preferred_element_type=f32)            # (BS, D)

        # ---- add & norm, fused [wres | wres@wf0] projection ----------------- #
        ln0 = layer_norm(xf + ma)
        wcl = wc_ref[l]                                              # (40, 2D)
        t = jnp.dot(ln0, wcl[0:D, :], preferred_element_type=f32) + wcl[D:D + 1, :]
        r0 = t[:, 0:D]                                               # LN@wres + bres
        ffp = jnp.maximum(t[:, D:2 * D], 0.0)                        # relu(r0@wf0 + bf0)
        wf1l = wf1_ref[l]                                            # (40, D)
        ff = jnp.dot(ffp, wf1l[0:D, :], preferred_element_type=f32) + wf1l[D:D + 1, :]

        ln1 = layer_norm(ff + r0)
        wrl = wres_ref[l]                                            # (40, D)
        xf = jnp.dot(ln1, wrl[0:D, :], preferred_element_type=f32) + wrl[D:D + 1, :]

    # ---- conv + relu + max-pool + final linear (filters lane-concatenated) -- #
    conv = conv_ref[...]                      # (max_k*D + BS, n_f*D)
    xsh = jnp.dot(shift_stack, xf, preferred_element_type=f32)       # (max_k*BS, D)
    c = conv[max_k * D:, :]                   # bias rows, invalid positions -1e30
    for i in range(max_k):
        c = c + jnp.dot(xsh[i * BS:(i + 1) * BS, :],
                        conv[i * D:(i + 1) * D, :], preferred_element_type=f32)
    c = jnp.maximum(c, 0.0)                   # relu (invalid rows -> 0)
    pooled = jnp.concatenate(
        [jnp.max(c[b * S:(b + 1) * S, :], axis=0, keepdims=True) for b in range(B)],
        axis=0)                               # (B, n_f*D) == torch concat of pools
    wl = wlin_ref[...]                        # (104, D): wlin rows + bias row
    out_ref[...] = (jnp.dot(pooled, wl[0:n_filters * D, :],
                            preferred_element_type=f32)
                    + wl[n_filters * D:n_filters * D + 1, :])


# ------------------------- one-time weight packing ------------------------- #
def prepare_params(params):
    """One-time fusion/packing of the module parameters into kernel inputs."""
    L, H, D, dk = NUM_LAYERS_DECODER, MULTI_HEADS, D_MODEL, DK
    S, B = SEQ_LEN, BATCH
    BS = B * S
    n_f = len(FILTER_SIZES)
    max_k = max(FILTER_SIZES)
    scale = 1.0 / math.sqrt(dk)
    wk, wv = params["wk"], params["wv"]

    # attention blocks, order: [(l, A/B, h)] -> index (l*2 + ab)*H + h
    blocks = []
    for l in range(L):
        p = params["layers"][l]
        for ab in range(2):
            for h in range(H):
                sl = slice(h * dk, (h + 1) * dk)
                if ab == 0:
                    blocks.append((p["wq"][:, sl] @ wk[:, sl].T) * scale)  # A_h
                else:
                    blocks.append(wv[:, sl] @ p["w0"][sl, :])              # B_h
    attn = jnp.stack(blocks)                                 # (L*2*H, D, D)

    def with_bias_row(w, b, rows):
        wb = jnp.concatenate([w, b], axis=0)
        pad = jnp.zeros((rows - wb.shape[0], wb.shape[1]), wb.dtype)
        return jnp.concatenate([wb, pad], axis=0)

    wc_l, wf1_l, wres_l = [], [], []
    for l in range(L):
        p = params["layers"][l]
        wc = jnp.concatenate([p["wres"], p["wres"] @ p["wf0"]], axis=1)            # (D, 2D)
        bc = jnp.concatenate([p["bres"], p["bres"] @ p["wf0"] + p["bf0"]], axis=1) # (1, 2D)
        wc_l.append(with_bias_row(wc, bc, 40))
        wf1_l.append(with_bias_row(p["wf1"], p["bf1"], 40))
        wres_l.append(with_bias_row(p["wres"], p["bres"], 40))
    wc_pack = jnp.stack(wc_l)      # (L, 40, 2D)
    wf1_pack = jnp.stack(wf1_l)    # (L, 40, D)
    wres_pack = jnp.stack(wres_l)  # (L, 40, D)

    # conv head: per-tap lane-concatenated filter weights + masked bias rows
    wtaps = np.zeros((max_k * D, n_f * D), np.float32)
    bias_mask = np.zeros((BS, n_f * D), np.float32)
    for f, k in enumerate(FILTER_SIZES):
        w = np.asarray(params["conv_w"][f])      # (k*D, D), tap-major rows
        b = np.asarray(params["conv_b"][f])      # (1, D)
        for i in range(k):
            wtaps[i * D:(i + 1) * D, f * D:(f + 1) * D] = w[i * D:(i + 1) * D, :]
        for r in range(BS):
            if (r % S) <= S - k:
                bias_mask[r, f * D:(f + 1) * D] = b[0]
            else:
                bias_mask[r, f * D:(f + 1) * D] = -1e30
    conv_pack = jnp.asarray(np.concatenate([wtaps, bias_mask], axis=0))  # (max_k*D+BS, n_f*D)

    # constants: window shift matrices, LN batch selector, attention batch mask
    shift = np.zeros((max_k * BS, BS), np.float32)
    for i in range(max_k):
        for r in range(BS):
            if r + i < BS and (r + i) // S == r // S:
                shift[i * BS + r, r + i] = 1.0
    same_batch = (np.arange(BS)[:, None] // S) == (np.arange(BS)[None, :] // S)
    sel = same_batch.astype(np.float32)                                    # (BS, BS)
    attn_mask = np.tile(np.where(same_batch, 0.0, -1e30).astype(np.float32), (H, 1))
    const_pack = jnp.asarray(np.concatenate([shift, sel, attn_mask], axis=0))

    wlin_pack = with_bias_row(params["wlin"], params["blin"], 104)         # (104, D)

    return {"attn": attn, "wc": wc_pack, "wf1": wf1_pack, "wres": wres_pack,
            "const": const_pack, "conv": conv_pack, "wlin": wlin_pack}


# ------------------------------ forward wrapper ----------------------------- #
def decoder_forward(x, packed):
    B, S, D = x.shape
    xf = x.reshape(B * S, D)                       # fold batch; free reshape
    kern = functools.partial(
        _fused_decoder_kernel, num_layers=NUM_LAYERS_DECODER, heads=MULTI_HEADS,
        batch=B, seq_len=S, d_model=D, n_filters=len(FILTER_SIZES),
        max_k=max(FILTER_SIZES))
    vmem = pl.BlockSpec(memory_space=pltpu.MemorySpace.VMEM)
    # Single kernel invocation, no grid: the whole working set (<150 KB) stays
    # resident in VMEM on v5e/v6e/v7x; no vmem_limit_bytes needed.
    return pl.pallas_call(
        kern,
        out_shape=jax.ShapeDtypeStruct((B, D), jnp.float32),
        in_specs=[vmem] * 8,
        out_specs=vmem,
    )(xf, packed["attn"], packed["wc"], packed["wf1"], packed["wres"],
      packed["const"], packed["conv"], packed["wlin"])


# ------------------------- pure-JAX reference ------------------------------ #
def decoder_reference(x, params):
    def ln(z):
        m = jnp.mean(z, axis=(-2, -1), keepdims=True)
        v = jnp.mean((z - m) ** 2, axis=(-2, -1), keepdims=True)
        return (z - m) / jnp.sqrt(v + LN_EPS)

    scale = 1.0 / math.sqrt(DK)
    for l in range(NUM_LAYERS_DECODER):
        p = params["layers"][l]
        qa = x @ p["wq"]
        ka = x @ params["wk"]
        va = x @ params["wv"]
        heads = []
        for h in range(MULTI_HEADS):
            q = qa[..., h * DK:(h + 1) * DK]
            k = ka[..., h * DK:(h + 1) * DK]
            v = va[..., h * DK:(h + 1) * DK]
            w = jnp.einsum("bsd,btd->bst", q, k) * scale
            pr = jax.nn.softmax(w, axis=-1)
            heads.append(jnp.einsum("bst,btd->bsd", pr, v))
        ma = jnp.concatenate(heads, axis=-1) @ p["w0"]
        r0 = ln(x + ma) @ p["wres"] + p["bres"]
        ff = jax.nn.relu(r0 @ p["wf0"] + p["bf0"]) @ p["wf1"] + p["bf1"]
        r1 = ln(ff + r0)
        x = r1 @ p["wres"] + p["bres"]

    pooled = []
    S = x.shape[1]
    for k, wc, bc in zip(FILTER_SIZES, params["conv_w"], params["conv_b"]):
        t = S - k + 1
        windows = jnp.concatenate([x[:, i:i + t, :] for i in range(k)], axis=-1)
        c = jax.nn.relu(windows @ wc + bc)
        pooled.append(jnp.max(c, axis=1))
    feat = jnp.concatenate(pooled, axis=-1)
    return feat @ params["wlin"] + params["blin"]


# ------------------------------ params ------------------------------------- #
def init_params(key):
    def nrm(key, shape, s=0.1):
        return jax.random.normal(key, shape, dtype=jnp.float32) * s

    keys = iter(jax.random.split(key, 64))
    params = {
        # encoder last-layer K/V projections (heads concatenated -> (D, D)), no bias
        "wk": nrm(next(keys), (D_MODEL, D_MODEL)),
        "wv": nrm(next(keys), (D_MODEL, D_MODEL)),
        "layers": [],
        "conv_w": [],
        "conv_b": [],
    }
    for _ in range(NUM_LAYERS_DECODER):
        params["layers"].append({
            "wq": nrm(next(keys), (D_MODEL, D_MODEL)),
            "w0": nrm(next(keys), (D_MODEL, D_MODEL)),
            "wres": nrm(next(keys), (D_MODEL, D_MODEL)),
            "bres": nrm(next(keys), (1, D_MODEL)),
            "wf0": nrm(next(keys), (D_MODEL, D_MODEL)),
            "bf0": nrm(next(keys), (1, D_MODEL)),
            "wf1": nrm(next(keys), (D_MODEL, D_MODEL)),
            "bf1": nrm(next(keys), (1, D_MODEL)),
        })
    for k in FILTER_SIZES:
        # torch Conv2d weight (D, 1, k, D) flattened row-major per out-channel,
        # stored transposed as (k*D, D) so conv == windows @ W
        params["conv_w"].append(nrm(next(keys), (k * D_MODEL, D_MODEL)))
        params["conv_b"].append(nrm(next(keys), (1, D_MODEL)))
    params["wlin"] = nrm(next(keys), (len(FILTER_SIZES) * D_MODEL, D_MODEL))
    params["blin"] = nrm(next(keys), (1, D_MODEL))
    return params


# -------------------------------- main -------------------------------------- #
if __name__ == "__main__":
    root = jax.random.PRNGKey(0)
    k_x, k_p = jax.random.split(root)
    x = jax.random.normal(k_x, (BATCH, SEQ_LEN, D_MODEL), dtype=jnp.float32)
    params = init_params(k_p)

    # One-time weight fusion/packing (not part of the per-forward path).
    packed = jax.block_until_ready(prepare_params(params))

    fwd = jax.jit(decoder_forward)
    out = jax.block_until_ready(fwd(x, packed))

    ref = jax.block_until_ready(decoder_reference(x, params))
    assert out.shape == (BATCH, D_MODEL), out.shape
    assert bool(jnp.all(jnp.isfinite(out)))
    assert bool(jnp.allclose(out, ref, atol=1e-2, rtol=1e-2)), (
        float(jnp.max(jnp.abs(out - ref))))

    print("KERNEL_OK")
</pallas_src>

<mosaic_0001>
module attributes {stable_mosaic.version = 11 : i64} {
  func.func @_fused_decoder_kernel(%arg0: memref<16x32xf32, #tpu.memory_space<vmem>>, %arg1: memref<16x32x32xf32, #tpu.memory_space<vmem>>, %arg2: memref<2x40x64xf32, #tpu.memory_space<vmem>>, %arg3: memref<2x40x32xf32, #tpu.memory_space<vmem>>, %arg4: memref<2x40x32xf32, #tpu.memory_space<vmem>>, %arg5: memref<144x16xf32, #tpu.memory_space<vmem>>, %arg6: memref<144x96xf32, #tpu.memory_space<vmem>>, %arg7: memref<104x32xf32, #tpu.memory_space<vmem>>, %arg8: memref<2x32xf32, #tpu.memory_space<vmem>>) attributes {dimension_semantics = [], scalar_prefetch = 0 : i64, scratch_operands = 0 : i64, tpu.core_type = #tpu.core_type<tc>} {
    %c0 = arith.constant 0 : index
    %c0_0 = arith.constant 0 : index
    %0 = vector.load %arg0[%c0, %c0_0] : memref<16x32xf32, #tpu.memory_space<vmem>>, vector<16x32xf32>
    %c0_1 = arith.constant 0 : index
    %c0_2 = arith.constant 0 : index
    %1 = vector.load %arg5[%c0_1, %c0_2] : memref<144x16xf32, #tpu.memory_space<vmem>>, vector<144x16xf32>
    %2 = vector.extract_strided_slice %1 {offsets = [0, 0], sizes = [64, 16], strides = [1, 1]} : vector<144x16xf32> to vector<64x16xf32>
    %3 = vector.extract_strided_slice %1 {offsets = [64, 0], sizes = [16, 16], strides = [1, 1]} : vector<144x16xf32> to vector<16x16xf32>
    %4 = vector.extract_strided_slice %1 {offsets = [80, 0], sizes = [64, 16], strides = [1, 1]} : vector<144x16xf32> to vector<64x16xf32>
    %c0_3 = arith.constant 0 : index
    %c0_4 = arith.constant 0 : index
    %c0_5 = arith.constant 0 : index
    %5 = vector.load %arg1[%c0_3, %c0_4, %c0_5] : memref<16x32x32xf32, #tpu.memory_space<vmem>>, vector<1x32x32xf32>
    %6 = vector.shape_cast %5 : vector<1x32x32xf32> to vector<32x32xf32>
    %cst = arith.constant dense<0.000000e+00> : vector<16x32xf32>
    %7 = tpu.matmul %0, %6, %cst {dimension_numbers = #tpu.dot_dimension_numbers<[1], [0], [0], [1], [0, 0, 1, 1], [], []>} : vector<16x32xf32>, vector<32x32xf32>, vector<16x32xf32> -> vector<16x32xf32>
    %c1 = arith.constant 1 : index
    %c0_6 = arith.constant 0 : index
    %c0_7 = arith.constant 0 : index
    %8 = vector.load %arg1[%c1, %c0_6, %c0_7] : memref<16x32x32xf32, #tpu.memory_space<vmem>>, vector<1x32x32xf32>
    %9 = vector.shape_cast %8 : vector<1x32x32xf32> to vector<32x32xf32>
    %cst_8 = arith.constant dense<0.000000e+00> : vector<16x32xf32>
    %10 = tpu.matmul %0, %9, %cst_8 {dimension_numbers = #tpu.dot_dimension_numbers<[1], [0], [0], [1], [0, 0, 1, 1], [], []>} : vector<16x32xf32>, vector<32x32xf32>, vector<16x32xf32> -> vector<16x32xf32>
    %c2 = arith.constant 2 : index
    %c0_9 = arith.constant 0 : index
    %c0_10 = arith.constant 0 : index
    %11 = vector.load %arg1[%c2, %c0_9, %c0_10] : memref<16x32x32xf32, #tpu.memory_space<vmem>>, vector<1x32x32xf32>
    %12 = vector.shape_cast %11 : vector<1x32x32xf32> to vector<32x32xf32>
    %cst_11 = arith.constant dense<0.000000e+00> : vector<16x32xf32>
    %13 = tpu.matmul %0, %12, %cst_11 {dimension_numbers = #tpu.dot_dimension_numbers<[1], [0], [0], [1], [0, 0, 1, 1], [], []>} : vector<16x32xf32>, vector<32x32xf32>, vector<16x32xf32> -> vector<16x32xf32>
    %c3 = arith.constant 3 : index
    %c0_12 = arith.constant 0 : index
    %c0_13 = arith.constant 0 : index
    %14 = vector.load %arg1[%c3, %c0_12, %c0_13] : memref<16x32x32xf32, #tpu.memory_space<vmem>>, vector<1x32x32xf32>
    %15 = vector.shape_cast %14 : vector<1x32x32xf32> to vector<32x32xf32>
    %cst_14 = arith.constant dense<0.000000e+00> : vector<16x32xf32>
    %16 = tpu.matmul %0, %15, %cst_14 {dimension_numbers = #tpu.dot_dimension_numbers<[1], [0], [0], [1], [0, 0, 1, 1], [], []>} : vector<16x32xf32>, vector<32x32xf32>, vector<16x32xf32> -> vector<16x32xf32>
    %c4 = arith.constant 4 : index
    %c0_15 = arith.constant 0 : index
    %c0_16 = arith.constant 0 : index
    %17 = vector.load %arg1[%c4, %c0_15, %c0_16] : memref<16x32x32xf32, #tpu.memory_space<vmem>>, vector<1x32x32xf32>
    %18 = vector.shape_cast %17 : vector<1x32x32xf32> to vector<32x32xf32>
    %cst_17 = arith.constant dense<0.000000e+00> : vector<16x32xf32>
    %19 = tpu.matmul %0, %18, %cst_17 {dimension_numbers = #tpu.dot_dimension_numbers<[1], [0], [0], [1], [0, 0, 1, 1], [], []>} : vector<16x32xf32>, vector<32x32xf32>, vector<16x32xf32> -> vector<16x32xf32>
    %c5 = arith.constant 5 : index
    %c0_18 = arith.constant 0 : index
    %c0_19 = arith.constant 0 : index
    %20 = vector.load %arg1[%c5, %c0_18, %c0_19] : memref<16x32x32xf32, #tpu.memory_space<vmem>>, vector<1x32x32xf32>
    %21 = vector.shape_cast %20 : vector<1x32x32xf32> to vector<32x32xf32>
    %cst_20 = arith.constant dense<0.000000e+00> : vector<16x32xf32>
    %22 = tpu.matmul %0, %21, %cst_20 {dimension_numbers = #tpu.dot_dimension_numbers<[1], [0], [0], [1], [0, 0, 1, 1], [], []>} : vector<16x32xf32>, vector<32x32xf32>, vector<16x32xf32> -> vector<16x32xf32>
    %c6 = arith.constant 6 : index
    %c0_21 = arith.constant 0 : index
    %c0_22 = arith.constant 0 : index
    %23 = vector.load %arg1[%c6, %c0_21, %c0_22] : memref<16x32x32xf32, #tpu.memory_space<vmem>>, vector<1x32x32xf32>
    %24 = vector.shape_cast %23 : vector<1x32x32xf32> to vector<32x32xf32>
    %cst_23 = arith.constant dense<0.000000e+00> : vector<16x32xf32>
    %25 = tpu.matmul %0, %24, %cst_23 {dimension_numbers = #tpu.dot_dimension_numbers<[1], [0], [0], [1], [0, 0, 1, 1], [], []>} : vector<16x32xf32>, vector<32x32xf32>, vector<16x32xf32> -> vector<16x32xf32>
    %c7 = arith.constant 7 : index
    %c0_24 = arith.constant 0 : index
    %c0_25 = arith.constant 0 : index
    %26 = vector.load %arg1[%c7, %c0_24, %c0_25] : memref<16x32x32xf32, #tpu.memory_space<vmem>>, vector<1x32x32xf32>
    %27 = vector.shape_cast %26 : vector<1x32x32xf32> to vector<32x32xf32>
    %cst_26 = arith.constant dense<0.000000e+00> : vector<16x32xf32>
    %28 = tpu.matmul %0, %27, %cst_26 {dimension_numbers = #tpu.dot_dimension_numbers<[1], [0], [0], [1], [0, 0, 1, 1], [], []>} : vector<16x32xf32>, vector<32x32xf32>, vector<16x32xf32> -> vector<16x32xf32>
    %cst_27 = arith.constant dense<0.000000e+00> : vector<16x16xf32>
    %29 = tpu.matmul %7, %0, %cst_27 {dimension_numbers = #tpu.dot_dimension_numbers<[1], [1], [0], [0], [0, 0, 1, 0], [], []>} : vector<16x32xf32>, vector<16x32xf32>, vector<16x16xf32> -> vector<16x16xf32>
    %cst_28 = arith.constant dense<0.000000e+00> : vector<16x16xf32>
    %30 = tpu.matmul %10, %0, %cst_28 {dimension_numbers = #tpu.dot_dimension_numbers<[1], [1], [0], [0], [0, 0, 1, 0], [], []>} : vector<16x32xf32>, vector<16x32xf32>, vector<16x16xf32> -> vector<16x16xf32>
    %cst_29 = arith.constant dense<0.000000e+00> : vector<16x16xf32>
    %31 = tpu.matmul %13, %0, %cst_29 {dimension_numbers = #tpu.dot_dimension_numbers<[1], [1], [0], [0], [0, 0, 1, 0], [], []>} : vector<16x32xf32>, vector<16x32xf32>, vector<16x16xf32> -> vector<16x16xf32>
    %cst_30 = arith.constant dense<0.000000e+00> : vector<16x16xf32>
    %32 = tpu.matmul %16, %0, %cst_30 {dimension_numbers = #tpu.dot_dimension_numbers<[1], [1], [0], [0], [0, 0, 1, 0], [], []>} : vector<16x32xf32>, vector<16x32xf32>, vector<16x16xf32> -> vector<16x16xf32>
    %33 = tpu.concatenate %29, %30, %31, %32 in 0 : vector<16x16xf32>, vector<16x16xf32>, vector<16x16xf32>, vector<16x16xf32> -> vector<64x16xf32>
    %34 = arith.addf %33, %4 : vector<64x16xf32>
    %cst_31 = arith.constant dense<0xFF800000> : vector<64xf32>
    %35 = vector.multi_reduction <maximumf>, %34, %cst_31 [1] : vector<64x16xf32> to vector<64xf32>
    %36 = vector.shape_cast %35 : vector<64xf32> to vector<64x1xf32>
    %37 = vector.broadcast %36 : vector<64x1xf32> to vector<64x16xf32>
    %38 = arith.subf %34, %37 : vector<64x16xf32>
    %39 = math.exp %38 : vector<64x16xf32>
    %cst_32 = arith.constant dense<0.000000e+00> : vector<64xf32>
    %40 = vector.multi_reduction <add>, %39, %cst_32 [1] : vector<64x16xf32> to vector<64xf32>
    %41 = vector.shape_cast %40 : vector<64xf32> to vector<64x1xf32>
    %42 = tpu.reciprocal %41 {approx = true} : vector<64x1xf32> -> vector<64x1xf32>
    %43 = vector.broadcast %42 : vector<64x1xf32> to vector<64x16xf32>
    %44 = arith.mulf %39, %43 : vector<64x16xf32>
    %45 = vector.extract_strided_slice %44 {offsets = [0, 0], sizes = [16, 16], strides = [1, 1]} : vector<64x16xf32> to vector<16x16xf32>
    %cst_33 = arith.constant dense<0.000000e+00> : vector<16x32xf32>
    %46 = tpu.matmul %45, %19, %cst_33 {dimension_numbers = #tpu.dot_dimension_numbers<[1], [0], [0], [1], [0, 0, 1, 1], [], []>} : vector<16x16xf32>, vector<16x32xf32>, vector<16x32xf32> -> vector<16x32xf32>
    %47 = vector.extract_strided_slice %44 {offsets = [16, 0], sizes = [16, 16], strides = [1, 1]} : vector<64x16xf32> to vector<16x16xf32>
    %cst_34 = arith.constant dense<0.000000e+00> : vector<16x32xf32>
    %48 = tpu.matmul %47, %22, %cst_34 {dimension_numbers = #tpu.dot_dimension_numbers<[1], [0], [0], [1], [0, 0, 1, 1], [], []>} : vector<16x16xf32>, vector<16x32xf32>, vector<16x32xf32> -> vector<16x32xf32>
    %49 = arith.addf %46, %48 : vector<16x32xf32>
    %50 = vector.extract_strided_slice %44 {offsets = [32, 0], sizes = [16, 16], strides = [1, 1]} : vector<64x16xf32> to vector<16x16xf32>
    %cst_35 = arith.constant dense<0.000000e+00> : vector<16x32xf32>
    %51 = tpu.matmul %50, %25, %cst_35 {dimension_numbers = #tpu.dot_dimension_numbers<[1], [0], [0], [1], [0, 0, 1, 1], [], []>} : vector<16x16xf32>, vector<16x32xf32>, vector<16x32xf32> -> vector<16x32xf32>
    %52 = arith.addf %49, %51 : vector<16x32xf32>
    %53 = vector.extract_strided_slice %44 {offsets = [48, 0], sizes = [16, 16], strides = [1, 1]} : vector<64x16xf32> to vector<16x16xf32>
    %cst_36 = arith.constant dense<0.000000e+00> : vector<16x32xf32>
    %54 = tpu.matmul %53, %28, %cst_36 {dimension_numbers = #tpu.dot_dimension_numbers<[1], [0], [0], [1], [0, 0, 1, 1], [], []>} : vector<16x16xf32>, vector<16x32xf32>, vector<16x32xf32> -> vector<16x32xf32>
    %55 = arith.addf %52, %54 : vector<16x32xf32>
    %56 = arith.addf %0, %55 : vector<16x32xf32>
    %cst_37 = arith.constant dense<0.000000e+00> : vector<16x32xf32>
    %57 = tpu.matmul %3, %56, %cst_37 {dimension_numbers = #tpu.dot_dimension_numbers<[1], [0], [0], [1], [0, 0, 1, 1], [], []>} : vector<16x16xf32>, vector<16x32xf32>, vector<16x32xf32> -> vector<16x32xf32>
    %cst_38 = arith.constant dense<0.000000e+00> : vector<16xf32>
    %58 = vector.multi_reduction <add>, %57, %cst_38 [1] : vector<16x32xf32> to vector<16xf32>
    %59 = vector.shape_cast %58 : vector<16xf32> to vector<16x1xf32>
    %60 = arith.mulf %56, %56 : vector<16x32xf32>
    %cst_39 = arith.constant dense<0.000000e+00> : vector<16x32xf32>
    %61 = tpu.matmul %3, %60, %cst_39 {dimension_numbers = #tpu.dot_dimension_numbers<[1], [0], [0], [1], [0, 0, 1, 1], [], []>} : vector<16x16xf32>, vector<16x32xf32>, vector<16x32xf32> -> vector<16x32xf32>
    %cst_40 = arith.constant dense<0.000000e+00> : vector<16xf32>
    %62 = vector.multi_reduction <add>, %61, %cst_40 [1] : vector<16x32xf32> to vector<16xf32>
    %63 = vector.shape_cast %62 : vector<16xf32> to vector<16x1xf32>
    %cst_41 = arith.constant 3.906250e-03 : f32
    %64 = vector.broadcast %cst_41 : f32 to vector<16x1xf32>
    %65 = arith.mulf %59, %64 : vector<16x1xf32>
    %cst_42 = arith.constant 3.906250e-03 : f32
    %66 = vector.broadcast %cst_42 : f32 to vector<16x1xf32>
    %67 = arith.mulf %63, %66 : vector<16x1xf32>
    %68 = arith.mulf %65, %65 : vector<16x1xf32>
    %69 = arith.subf %67, %68 : vector<16x1xf32>
    %70 = vector.broadcast %65 : vector<16x1xf32> to vector<16x32xf32>
    %71 = arith.subf %56, %70 : vector<16x32xf32>
    %cst_43 = arith.constant 9.99999974E-6 : f32
    %72 = vector.broadcast %cst_43 : f32 to vector<16x1xf32>
    %73 = arith.addf %69, %72 : vector<16x1xf32>
    %74 = math.rsqrt %73 : vector<16x1xf32>
    %75 = vector.broadcast %74 : vector<16x1xf32> to vector<16x32xf32>
    %76 = arith.mulf %71, %75 : vector<16x32xf32>
    %c0_44 = arith.constant 0 : index
    %c0_45 = arith.constant 0 : index
    %c0_46 = arith.constant 0 : index
    %77 = vector.load %arg2[%c0_44, %c0_45, %c0_46] : memref<2x40x64xf32, #tpu.memory_space<vmem>>, vector<1x40x64xf32>
    %78 = vector.shape_cast %77 : vector<1x40x64xf32> to vector<40x64xf32>
    %79 = vector.extract_strided_slice %78 {offsets = [0, 0], sizes = [32, 64], strides = [1, 1]} : vector<40x64xf32> to vector<32x64xf32>
    %cst_47 = arith.constant dense<0.000000e+00> : vector<16x64xf32>
    %80 = tpu.matmul %76, %79, %cst_47 {dimension_numbers = #tpu.dot_dimension_numbers<[1], [0], [0], [1], [0, 0, 1, 1], [], []>} : vector<16x32xf32>, vector<32x64xf32>, vector<16x64xf32> -> vector<16x64xf32>
    %81 = vector.extract_strided_slice %78 {offsets = [32, 0], sizes = [1, 64], strides = [1, 1]} : vector<40x64xf32> to vector<1x64xf32>
    %82 = vector.broadcast %81 : vector<1x64xf32> to vector<16x64xf32>
    %83 = arith.addf %80, %82 : vector<16x64xf32>
    %84 = vector.extract_strided_slice %83 {offsets = [0, 0], sizes = [16, 32], strides = [1, 1]} : vector<16x64xf32> to vector<16x32xf32>
    %85 = vector.extract_strided_slice %83 {offsets = [0, 32], sizes = [16, 32], strides = [1, 1]} : vector<16x64xf32> to vector<16x32xf32>
    %cst_48 = arith.constant 0.000000e+00 : f32
    %86 = vector.broadcast %cst_48 : f32 to vector<16x32xf32>
    %87 = arith.maximumf %85, %86 : vector<16x32xf32>
    %c0_49 = arith.constant 0 : index
    %c0_50 = arith.constant 0 : index
    %c0_51 = arith.constant 0 : index
    %88 = vector.load %arg3[%c0_49, %c0_50, %c0_51] : memref<2x40x32xf32, #tpu.memory_space<vmem>>, vector<1x40x32xf32>
    %89 = vector.shape_cast %88 : vector<1x40x32xf32> to vector<40x32xf32>
    %90 = vector.extract_strided_slice %89 {offsets = [0, 0], sizes = [32, 32], strides = [1, 1]} : vector<40x32xf32> to vector<32x32xf32>
    %cst_52 = arith.constant dense<0.000000e+00> : vector<16x32xf32>
    %91 = tpu.matmul %87, %90, %cst_52 {dimension_numbers = #tpu.dot_dimension_numbers<[1], [0], [0], [1], [0, 0, 1, 1], [], []>} : vector<16x32xf32>, vector<32x32xf32>, vector<16x32xf32> -> vector<16x32xf32>
    %92 = vector.extract_strided_slice %89 {offsets = [32, 0], sizes = [1, 32], strides = [1, 1]} : vector<40x32xf32> to vector<1x32xf32>
    %93 = vector.broadcast %92 : vector<1x32xf32> to vector<16x32xf32>
    %94 = arith.addf %91, %93 : vector<16x32xf32>
    %95 = arith.addf %94, %84 : vector<16x32xf32>
    %cst_53 = arith.constant dense<0.000000e+00> : vector<16x32xf32>
    %96 = tpu.matmul %3, %95, %cst_53 {dimension_numbers = #tpu.dot_dimension_numbers<[1], [0], [0], [1], [0, 0, 1, 1], [], []>} : vector<16x16xf32>, vector<16x32xf32>, vector<16x32xf32> -> vector<16x32xf32>
    %cst_54 = arith.constant dense<0.000000e+00> : vector<16xf32>
    %97 = vector.multi_reduction <add>, %96, %cst_54 [1] : vector<16x32xf32> to vector<16xf32>
    %98 = vector.shape_cast %97 : vector<16xf32> to vector<16x1xf32>
    %99 = arith.mulf %95, %95 : vector<16x32xf32>
    %cst_55 = arith.constant dense<0.000000e+00> : vector<16x32xf32>
    %100 = tpu.matmul %3, %99, %cst_55 {dimension_numbers = #tpu.dot_dimension_numbers<[1], [0], [0], [1], [0, 0, 1, 1], [], []>} : vector<16x16xf32>, vector<16x32xf32>, vector<16x32xf32> -> vector<16x32xf32>
    %cst_56 = arith.constant dense<0.000000e+00> : vector<16xf32>
    %101 = vector.multi_reduction <add>, %100, %cst_56 [1] : vector<16x32xf32> to vector<16xf32>
    %102 = vector.shape_cast %101 : vector<16xf32> to vector<16x1xf32>
    %cst_57 = arith.constant 3.906250e-03 : f32
    %103 = vector.broadcast %cst_57 : f32 to vector<16x1xf32>
    %104 = arith.mulf %98, %103 : vector<16x1xf32>
    %cst_58 = arith.constant 3.906250e-03 : f32
    %105 = vector.broadcast %cst_58 : f32 to vector<16x1xf32>
    %106 = arith.mulf %102, %105 : vector<16x1xf32>
    %107 = arith.mulf %104, %104 : vector<16x1xf32>
    %108 = arith.subf %106, %107 : vector<16x1xf32>
    %109 = vector.broadcast %104 : vector<16x1xf32> to vector<16x32xf32>
    %110 = arith.subf %95, %109 : vector<16x32xf32>
    %cst_59 = arith.constant 9.99999974E-6 : f32
    %111 = vector.broadcast %cst_59 : f32 to vector<16x1xf32>
    %112 = arith.addf %108, %111 : vector<16x1xf32>
    %113 = math.rsqrt %112 : vector<16x1xf32>
    %114 = vector.broadcast %113 : vector<16x1xf32> to vector<16x32xf32>
    %115 = arith.mulf %110, %114 : vector<16x32xf32>
    %c0_60 = arith.constant 0 : index
    %c0_61 = arith.constant 0 : index
    %c0_62 = arith.constant 0 : index
    %116 = vector.load %arg4[%c0_60, %c0_61, %c0_62] : memref<2x40x32xf32, #tpu.memory_space<vmem>>, vector<1x40x32xf32>
    %117 = vector.shape_cast %116 : vector<1x40x32xf32> to vector<40x32xf32>
    %118 = vector.extract_strided_slice %117 {offsets = [0, 0], sizes = [32, 32], strides = [1, 1]} : vector<40x32xf32> to vector<32x32xf32>
    %cst_63 = arith.constant dense<0.000000e+00> : vector<16x32xf32>
    %119 = tpu.matmul %115, %118, %cst_63 {dimension_numbers = #tpu.dot_dimension_numbers<[1], [0], [0], [1], [0, 0, 1, 1], [], []>} : vector<16x32xf32>, vector<32x32xf32>, vector<16x32xf32> -> vector<16x32xf32>
    %120 = vector.extract_strided_slice %117 {offsets = [32, 0], sizes = [1, 32], strides = [1, 1]} : vector<40x32xf32> to vector<1x32xf32>
    %121 = vector.broadcast %120 : vector<1x32xf32> to vector<16x32xf32>
    %122 = arith.addf %119, %121 : vector<16x32xf32>
    %c8 = arith.constant 8 : index
    %c0_64 = arith.constant 0 : index
    %c0_65 = arith.constant 0 : index
    %123 = vector.load %arg1[%c8, %c0_64, %c0_65] : memref<16x32x32xf32, #tpu.memory_space<vmem>>, vector<1x32x32xf32>
    %124 = vector.shape_cast %123 : vector<1x32x32xf32> to vector<32x32xf32>
    %cst_66 = arith.constant dense<0.000000e+00> : vector<16x32xf32>
    %125 = tpu.matmul %122, %124, %cst_66 {dimension_numbers = #tpu.dot_dimension_numbers<[1], [0], [0], [1], [0, 0, 1, 1], [], []>} : vector<16x32xf32>, vector<32x32xf32>, vector<16x32xf32> -> vector<16x32xf32>
    %c9 = arith.constant 9 : index
    %c0_67 = arith.constant 0 : index
    %c0_68 = arith.constant 0 : index
    %126 = vector.load %arg1[%c9, %c0_67, %c0_68] : memref<16x32x32xf32, #tpu.memory_space<vmem>>, vector<1x32x32xf32>
    %127 = vector.shape_cast %126 : vector<1x32x32xf32> to vector<32x32xf32>
    %cst_69 = arith.constant dense<0.000000e+00> : vector<16x32xf32>
    %128 = tpu.matmul %122, %127, %cst_69 {dimension_numbers = #tpu.dot_dimension_numbers<[1], [0], [0], [1], [0, 0, 1, 1], [], []>} : vector<16x32xf32>, vector<32x32xf32>, vector<16x32xf32> -> vector<16x32xf32>
    %c10 = arith.constant 10 : index
    %c0_70 = arith.constant 0 : index
    %c0_71 = arith.constant 0 : index
    %129 = vector.load %arg1[%c10, %c0_70, %c0_71] : memref<16x32x32xf32, #tpu.memory_space<vmem>>, vector<1x32x32xf32>
    %130 = vector.shape_cast %129 : vector<1x32x32xf32> to vector<32x32xf32>
    %cst_72 = arith.constant dense<0.000000e+00> : vector<16x32xf32>
    %131 = tpu.matmul %122, %130, %cst_72 {dimension_numbers = #tpu.dot_dimension_numbers<[1], [0], [0], [1], [0, 0, 1, 1], [], []>} : vector<16x32xf32>, vector<32x32xf32>, vector<16x32xf32> -> vector<16x32xf32>
    %c11 = arith.constant 11 : index
    %c0_73 = arith.constant 0 : index
    %c0_74 = arith.constant 0 : index
    %132 = vector.load %arg1[%c11, %c0_73, %c0_74] : memref<16x32x32xf32, #tpu.memory_space<vmem>>, vector<1x32x32xf32>
    %133 = vector.shape_cast %132 : vector<1x32x32xf32> to vector<32x32xf32>
    %cst_75 = arith.constant dense<0.000000e+00> : vector<16x32xf32>
    %134 = tpu.matmul %122, %133, %cst_75 {dimension_numbers = #tpu.dot_dimension_numbers<[1], [0], [0], [1], [0, 0, 1, 1], [], []>} : vector<16x32xf32>, vector<32x32xf32>, vector<16x32xf32> -> vector<16x32xf32>
    %c12 = arith.constant 12 : index
    %c0_76 = arith.constant 0 : index
    %c0_77 = arith.constant 0 : index
    %135 = vector.load %arg1[%c12, %c0_76, %c0_77] : memref<16x32x32xf32, #tpu.memory_space<vmem>>, vector<1x32x32xf32>
    %136 = vector.shape_cast %135 : vector<1x32x32xf32> to vector<32x32xf32>
    %cst_78 = arith.constant dense<0.000000e+00> : vector<16x32xf32>
    %137 = tpu.matmul %122, %136, %cst_78 {dimension_numbers = #tpu.dot_dimension_numbers<[1], [0], [0], [1], [0, 0, 1, 1], [], []>} : vector<16x32xf32>, vector<32x32xf32>, vector<16x32xf32> -> vector<16x32xf32>
    %c13 = arith.constant 13 : index
    %c0_79 = arith.constant 0 : index
    %c0_80 = arith.constant 0 : index
    %138 = vector.load %arg1[%c13, %c0_79, %c0_80] : memref<16x32x32xf32, #tpu.memory_space<vmem>>, vector<1x32x32xf32>
    %139 = vector.shape_cast %138 : vector<1x32x32xf32> to vector<32x32xf32>
    %cst_81 = arith.constant dense<0.000000e+00> : vector<16x32xf32>
    %140 = tpu.matmul %122, %139, %cst_81 {dimension_numbers = #tpu.dot_dimension_numbers<[1], [0], [0], [1], [0, 0, 1, 1], [], []>} : vector<16x32xf32>, vector<32x32xf32>, vector<16x32xf32> -> vector<16x32xf32>
    %c14 = arith.constant 14 : index
    %c0_82 = arith.constant 0 : index
    %c0_83 = arith.constant 0 : index
    %141 = vector.load %arg1[%c14, %c0_82, %c0_83] : memref<16x32x32xf32, #tpu.memory_space<vmem>>, vector<1x32x32xf32>
    %142 = vector.shape_cast %141 : vector<1x32x32xf32> to vector<32x32xf32>
    %cst_84 = arith.constant dense<0.000000e+00> : vector<16x32xf32>
    %143 = tpu.matmul %122, %142, %cst_84 {dimension_numbers = #tpu.dot_dimension_numbers<[1], [0], [0], [1], [0, 0, 1, 1], [], []>} : vector<16x32xf32>, vector<32x32xf32>, vector<16x32xf32> -> vector<16x32xf32>
    %c15 = arith.constant 15 : index
    %c0_85 = arith.constant 0 : index
    %c0_86 = arith.constant 0 : index
    %144 = vector.load %arg1[%c15, %c0_85, %c0_86] : memref<16x32x32xf32, #tpu.memory_space<vmem>>, vector<1x32x32xf32>
    %145 = vector.shape_cast %144 : vector<1x32x32xf32> to vector<32x32xf32>
    %cst_87 = arith.constant dense<0.000000e+00> : vector<16x32xf32>
    %146 = tpu.matmul %122, %145, %cst_87 {dimension_numbers = #tpu.dot_dimension_numbers<[1], [0], [0], [1], [0, 0, 1, 1], [], []>} : vector<16x32xf32>, vector<32x32xf32>, vector<16x32xf32> -> vector<16x32xf32>
    %cst_88 = arith.constant dense<0.000000e+00> : vector<16x16xf32>
    %147 = tpu.matmul %125, %122, %cst_88 {dimension_numbers = #tpu.dot_dimension_numbers<[1], [1], [0], [0], [0, 0, 1, 0], [], []>} : vector<16x32xf32>, vector<16x32xf32>, vector<16x16xf32> -> vector<16x16xf32>
    %cst_89 = arith.constant dense<0.000000e+00> : vector<16x16xf32>
    %148 = tpu.matmul %128, %122, %cst_89 {dimension_numbers = #tpu.dot_dimension_numbers<[1], [1], [0], [0], [0, 0, 1, 0], [], []>} : vector<16x32xf32>, vector<16x32xf32>, vector<16x16xf32> -> vector<16x16xf32>
    %cst_90 = arith.constant dense<0.000000e+00> : vector<16x16xf32>
    %149 = tpu.matmul %131, %122, %cst_90 {dimension_numbers = #tpu.dot_dimension_numbers<[1], [1], [0], [0], [0, 0, 1, 0], [], []>} : vector<16x32xf32>, vector<16x32xf32>, vector<16x16xf32> -> vector<16x16xf32>
    %cst_91 = arith.constant dense<0.000000e+00> : vector<16x16xf32>
    %150 = tpu.matmul %134, %122, %cst_91 {dimension_numbers = #tpu.dot_dimension_numbers<[1], [1], [0], [0], [0, 0, 1, 0], [], []>} : vector<16x32xf32>, vector<16x32xf32>, vector<16x16xf32> -> vector<16x16xf32>
    %151 = tpu.concatenate %147, %148, %149, %150 in 0 : vector<16x16xf32>, vector<16x16xf32>, vector<16x16xf32>, vector<16x16xf32> -> vector<64x16xf32>
    %152 = arith.addf %151, %4 : vector<64x16xf32>
    %cst_92 = arith.constant dense<0xFF800000> : vector<64xf32>
    %153 = vector.multi_reduction <maximumf>, %152, %cst_92 [1] : vector<64x16xf32> to vector<64xf32>
    %154 = vector.shape_cast %153 : vector<64xf32> to vector<64x1xf32>
    %155 = vector.broadcast %154 : vector<64x1xf32> to vector<64x16xf32>
    %156 = arith.subf %152, %155 : vector<64x16xf32>
    %157 = math.exp %156 : vector<64x16xf32>
    %cst_93 = arith.constant dense<0.000000e+00> : vector<64xf32>
    %158 = vector.multi_reduction <add>, %157, %cst_93 [1] : vector<64x16xf32> to vector<64xf32>
    %159 = vector.shape_cast %158 : vector<64xf32> to vector<64x1xf32>
    %160 = tpu.reciprocal %159 {approx = true} : vector<64x1xf32> -> vector<64x1xf32>
    %161 = vector.broadcast %160 : vector<64x1xf32> to vector<64x16xf32>
    %162 = arith.mulf %157, %161 : vector<64x16xf32>
    %163 = vector.extract_strided_slice %162 {offsets = [0, 0], sizes = [16, 16], strides = [1, 1]} : vector<64x16xf32> to vector<16x16xf32>
    %cst_94 = arith.constant dense<0.000000e+00> : vector<16x32xf32>
    %164 = tpu.matmul %163, %137, %cst_94 {dimension_numbers = #tpu.dot_dimension_numbers<[1], [0], [0], [1], [0, 0, 1, 1], [], []>} : vector<16x16xf32>, vector<16x32xf32>, vector<16x32xf32> -> vector<16x32xf32>
    %165 = vector.extract_strided_slice %162 {offsets = [16, 0], sizes = [16, 16], strides = [1, 1]} : vector<64x16xf32> to vector<16x16xf32>
    %cst_95 = arith.constant dense<0.000000e+00> : vector<16x32xf32>
    %166 = tpu.matmul %165, %140, %cst_95 {dimension_numbers = #tpu.dot_dimension_numbers<[1], [0], [0], [1], [0, 0, 1, 1], [], []>} : vector<16x16xf32>, vector<16x32xf32>, vector<16x32xf32> -> vector<16x32xf32>
    %167 = arith.addf %164, %166 : vector<16x32xf32>
    %168 = vector.extract_strided_slice %162 {offsets = [32, 0], sizes = [16, 16], strides = [1, 1]} : vector<64x16xf32> to vector<16x16xf32>
    %cst_96 = arith.constant dense<0.000000e+00> : vector<16x32xf32>
    %169 = tpu.matmul %168, %143, %cst_96 {dimension_numbers = #tpu.dot_dimension_numbers<[1], [0], [0], [1], [0, 0, 1, 1], [], []>} : vector<16x16xf32>, vector<16x32xf32>, vector<16x32xf32> -> vector<16x32xf32>
    %170 = arith.addf %167, %169 : vector<16x32xf32>
    %171 = vector.extract_strided_slice %162 {offsets = [48, 0], sizes = [16, 16], strides = [1, 1]} : vector<64x16xf32> to vector<16x16xf32>
    %cst_97 = arith.constant dense<0.000000e+00> : vector<16x32xf32>
    %172 = tpu.matmul %171, %146, %cst_97 {dimension_numbers = #tpu.dot_dimension_numbers<[1], [0], [0], [1], [0, 0, 1, 1], [], []>} : vector<16x16xf32>, vector<16x32xf32>, vector<16x32xf32> -> vector<16x32xf32>
    %173 = arith.addf %170, %172 : vector<16x32xf32>
    %174 = arith.addf %122, %173 : vector<16x32xf32>
    %cst_98 = arith.constant dense<0.000000e+00> : vector<16x32xf32>
    %175 = tpu.matmul %3, %174, %cst_98 {dimension_numbers = #tpu.dot_dimension_numbers<[1], [0], [0], [1], [0, 0, 1, 1], [], []>} : vector<16x16xf32>, vector<16x32xf32>, vector<16x32xf32> -> vector<16x32xf32>
    %cst_99 = arith.constant dense<0.000000e+00> : vector<16xf32>
    %176 = vector.multi_reduction <add>, %175, %cst_99 [1] : vector<16x32xf32> to vector<16xf32>
    %177 = vector.shape_cast %176 : vector<16xf32> to vector<16x1xf32>
    %178 = arith.mulf %174, %174 : vector<16x32xf32>
    %cst_100 = arith.constant dense<0.000000e+00> : vector<16x32xf32>
    %179 = tpu.matmul %3, %178, %cst_100 {dimension_numbers = #tpu.dot_dimension_numbers<[1], [0], [0], [1], [0, 0, 1, 1], [], []>} : vector<16x16xf32>, vector<16x32xf32>, vector<16x32xf32> -> vector<16x32xf32>
    %cst_101 = arith.constant dense<0.000000e+00> : vector<16xf32>
    %180 = vector.multi_reduction <add>, %179, %cst_101 [1] : vector<16x32xf32> to vector<16xf32>
    %181 = vector.shape_cast %180 : vector<16xf32> to vector<16x1xf32>
    %cst_102 = arith.constant 3.906250e-03 : f32
    %182 = vector.broadcast %cst_102 : f32 to vector<16x1xf32>
    %183 = arith.mulf %177, %182 : vector<16x1xf32>
    %cst_103 = arith.constant 3.906250e-03 : f32
    %184 = vector.broadcast %cst_103 : f32 to vector<16x1xf32>
    %185 = arith.mulf %181, %184 : vector<16x1xf32>
    %186 = arith.mulf %183, %183 : vector<16x1xf32>
    %187 = arith.subf %185, %186 : vector<16x1xf32>
    %188 = vector.broadcast %183 : vector<16x1xf32> to vector<16x32xf32>
    %189 = arith.subf %174, %188 : vector<16x32xf32>
    %cst_104 = arith.constant 9.99999974E-6 : f32
    %190 = vector.broadcast %cst_104 : f32 to vector<16x1xf32>
    %191 = arith.addf %187, %190 : vector<16x1xf32>
    %192 = math.rsqrt %191 : vector<16x1xf32>
    %193 = vector.broadcast %192 : vector<16x1xf32> to vector<16x32xf32>
    %194 = arith.mulf %189, %193 : vector<16x32xf32>
    %c1_105 = arith.constant 1 : index
    %c0_106 = arith.constant 0 : index
    %c0_107 = arith.constant 0 : index
    %195 = vector.load %arg2[%c1_105, %c0_106, %c0_107] : memref<2x40x64xf32, #tpu.memory_space<vmem>>, vector<1x40x64xf32>
    %196 = vector.shape_cast %195 : vector<1x40x64xf32> to vector<40x64xf32>
    %197 = vector.extract_strided_slice %196 {offsets = [0, 0], sizes = [32, 64], strides = [1, 1]} : vector<40x64xf32> to vector<32x64xf32>
    %cst_108 = arith.constant dense<0.000000e+00> : vector<16x64xf32>
    %198 = tpu.matmul %194, %197, %cst_108 {dimension_numbers = #tpu.dot_dimension_numbers<[1], [0], [0], [1], [0, 0, 1, 1], [], []>} : vector<16x32xf32>, vector<32x64xf32>, vector<16x64xf32> -> vector<16x64xf32>
    %199 = vector.extract_strided_slice %196 {offsets = [32, 0], sizes = [1, 64], strides = [1, 1]} : vector<40x64xf32> to vector<1x64xf32>
    %200 = vector.broadcast %199 : vector<1x64xf32> to vector<16x64xf32>
    %201 = arith.addf %198, %200 : vector<16x64xf32>
    %202 = vector.extract_strided_slice %201 {offsets = [0, 0], sizes = [16, 32], strides = [1, 1]} : vector<16x64xf32> to vector<16x32xf32>
    %203 = vector.extract_strided_slice %201 {offsets = [0, 32], sizes = [16, 32], strides = [1, 1]} : vector<16x64xf32> to vector<16x32xf32>
    %cst_109 = arith.constant 0.000000e+00 : f32
    %204 = vector.broadcast %cst_109 : f32 to vector<16x32xf32>
    %205 = arith.maximumf %203, %204 : vector<16x32xf32>
    %c1_110 = arith.constant 1 : index
    %c0_111 = arith.constant 0 : index
    %c0_112 = arith.constant 0 : index
    %206 = vector.load %arg3[%c1_110, %c0_111, %c0_112] : memref<2x40x32xf32, #tpu.memory_space<vmem>>, vector<1x40x32xf32>
    %207 = vector.shape_cast %206 : vector<1x40x32xf32> to vector<40x32xf32>
    %208 = vector.extract_strided_slice %207 {offsets = [0, 0], sizes = [32, 32], strides = [1, 1]} : vector<40x32xf32> to vector<32x32xf32>
    %cst_113 = arith.constant dense<0.000000e+00> : vector<16x32xf32>
    %209 = tpu.matmul %205, %208, %cst_113 {dimension_numbers = #tpu.dot_dimension_numbers<[1], [0], [0], [1], [0, 0, 1, 1], [], []>} : vector<16x32xf32>, vector<32x32xf32>, vector<16x32xf32> -> vector<16x32xf32>
    %210 = vector.extract_strided_slice %207 {offsets = [32, 0], sizes = [1, 32], strides = [1, 1]} : vector<40x32xf32> to vector<1x32xf32>
    %211 = vector.broadcast %210 : vector<1x32xf32> to vector<16x32xf32>
    %212 = arith.addf %209, %211 : vector<16x32xf32>
    %213 = arith.addf %212, %202 : vector<16x32xf32>
    %cst_114 = arith.constant dense<0.000000e+00> : vector<16x32xf32>
    %214 = tpu.matmul %3, %213, %cst_114 {dimension_numbers = #tpu.dot_dimension_numbers<[1], [0], [0], [1], [0, 0, 1, 1], [], []>} : vector<16x16xf32>, vector<16x32xf32>, vector<16x32xf32> -> vector<16x32xf32>
    %cst_115 = arith.constant dense<0.000000e+00> : vector<16xf32>
    %215 = vector.multi_reduction <add>, %214, %cst_115 [1] : vector<16x32xf32> to vector<16xf32>
    %216 = vector.shape_cast %215 : vector<16xf32> to vector<16x1xf32>
    %217 = arith.mulf %213, %213 : vector<16x32xf32>
    %cst_116 = arith.constant dense<0.000000e+00> : vector<16x32xf32>
    %218 = tpu.matmul %3, %217, %cst_116 {dimension_numbers = #tpu.dot_dimension_numbers<[1], [0], [0], [1], [0, 0, 1, 1], [], []>} : vector<16x16xf32>, vector<16x32xf32>, vector<16x32xf32> -> vector<16x32xf32>
    %cst_117 = arith.constant dense<0.000000e+00> : vector<16xf32>
    %219 = vector.multi_reduction <add>, %218, %cst_117 [1] : vector<16x32xf32> to vector<16xf32>
    %220 = vector.shape_cast %219 : vector<16xf32> to vector<16x1xf32>
    %cst_118 = arith.constant 3.906250e-03 : f32
    %221 = vector.broadcast %cst_118 : f32 to vector<16x1xf32>
    %222 = arith.mulf %216, %221 : vector<16x1xf32>
    %cst_119 = arith.constant 3.906250e-03 : f32
    %223 = vector.broadcast %cst_119 : f32 to vector<16x1xf32>
    %224 = arith.mulf %220, %223 : vector<16x1xf32>
    %225 = arith.mulf %222, %222 : vector<16x1xf32>
    %226 = arith.subf %224, %225 : vector<16x1xf32>
    %227 = vector.broadcast %222 : vector<16x1xf32> to vector<16x32xf32>
    %228 = arith.subf %213, %227 : vector<16x32xf32>
    %cst_120 = arith.constant 9.99999974E-6 : f32
    %229 = vector.broadcast %cst_120 : f32 to vector<16x1xf32>
    %230 = arith.addf %226, %229 : vector<16x1xf32>
    %231 = math.rsqrt %230 : vector<16x1xf32>
    %232 = vector.broadcast %231 : vector<16x1xf32> to vector<16x32xf32>
    %233 = arith.mulf %228, %232 : vector<16x32xf32>
    %c1_121 = arith.constant 1 : index
    %c0_122 = arith.constant 0 : index
    %c0_123 = arith.constant 0 : index
    %234 = vector.load %arg4[%c1_121, %c0_122, %c0_123] : memref<2x40x32xf32, #tpu.memory_space<vmem>>, vector<1x40x32xf32>
    %235 = vector.shape_cast %234 : vector<1x40x32xf32> to vector<40x32xf32>
    %236 = vector.extract_strided_slice %235 {offsets = [0, 0], sizes = [32, 32], strides = [1, 1]} : vector<40x32xf32> to vector<32x32xf32>
    %cst_124 = arith.constant dense<0.000000e+00> : vector<16x32xf32>
    %237 = tpu.matmul %233, %236, %cst_124 {dimension_numbers = #tpu.dot_dimension_numbers<[1], [0], [0], [1], [0, 0, 1, 1], [], []>} : vector<16x32xf32>, vector<32x32xf32>, vector<16x32xf32> -> vector<16x32xf32>
    %238 = vector.extract_strided_slice %235 {offsets = [32, 0], sizes = [1, 32], strides = [1, 1]} : vector<40x32xf32> to vector<1x32xf32>
    %239 = vector.broadcast %238 : vector<1x32xf32> to vector<16x32xf32>
    %240 = arith.addf %237, %239 : vector<16x32xf32>
    %c0_125 = arith.constant 0 : index
    %c0_126 = arith.constant 0 : index
    %241 = vector.load %arg6[%c0_125, %c0_126] : memref<144x96xf32, #tpu.memory_space<vmem>>, vector<144x96xf32>
    %cst_127 = arith.constant dense<0.000000e+00> : vector<64x32xf32>
    %242 = tpu.matmul %2, %240, %cst_127 {dimension_numbers = #tpu.dot_dimension_numbers<[1], [0], [0], [1], [0, 0, 1, 1], [], []>} : vector<64x16xf32>, vector<16x32xf32>, vector<64x32xf32> -> vector<64x32xf32>
    %243 = vector.extract_strided_slice %241 {offsets = [128, 0], sizes = [16, 96], strides = [1, 1]} : vector<144x96xf32> to vector<16x96xf32>
    %244 = vector.extract_strided_slice %242 {offsets = [0, 0], sizes = [16, 32], strides = [1, 1]} : vector<64x32xf32> to vector<16x32xf32>
    %245 = vector.extract_strided_slice %241 {offsets = [0, 0], sizes = [32, 96], strides = [1, 1]} : vector<144x96xf32> to vector<32x96xf32>
    %cst_128 = arith.constant dense<0.000000e+00> : vector<16x96xf32>
    %246 = tpu.matmul %244, %245, %cst_128 {dimension_numbers = #tpu.dot_dimension_numbers<[1], [0], [0], [1], [0, 0, 1, 1], [], []>} : vector<16x32xf32>, vector<32x96xf32>, vector<16x96xf32> -> vector<16x96xf32>
    %247 = arith.addf %243, %246 : vector<16x96xf32>
    %248 = vector.extract_strided_slice %242 {offsets = [16, 0], sizes = [16, 32], strides = [1, 1]} : vector<64x32xf32> to vector<16x32xf32>
    %249 = vector.extract_strided_slice %241 {offsets = [32, 0], sizes = [32, 96], strides = [1, 1]} : vector<144x96xf32> to vector<32x96xf32>
    %cst_129 = arith.constant dense<0.000000e+00> : vector<16x96xf32>
    %250 = tpu.matmul %248, %249, %cst_129 {dimension_numbers = #tpu.dot_dimension_numbers<[1], [0], [0], [1], [0, 0, 1, 1], [], []>} : vector<16x32xf32>, vector<32x96xf32>, vector<16x96xf32> -> vector<16x96xf32>
    %251 = arith.addf %247, %250 : vector<16x96xf32>
    %252 = vector.extract_strided_slice %242 {offsets = [32, 0], sizes = [16, 32], strides = [1, 1]} : vector<64x32xf32> to vector<16x32xf32>
    %253 = vector.extract_strided_slice %241 {offsets = [64, 0], sizes = [32, 96], strides = [1, 1]} : vector<144x96xf32> to vector<32x96xf32>
    %cst_130 = arith.constant dense<0.000000e+00> : vector<16x96xf32>
    %254 = tpu.matmul %252, %253, %cst_130 {dimension_numbers = #tpu.dot_dimension_numbers<[1], [0], [0], [1], [0, 0, 1, 1], [], []>} : vector<16x32xf32>, vector<32x96xf32>, vector<16x96xf32> -> vector<16x96xf32>
    %255 = arith.addf %251, %254 : vector<16x96xf32>
    %256 = vector.extract_strided_slice %242 {offsets = [48, 0], sizes = [16, 32], strides = [1, 1]} : vector<64x32xf32> to vector<16x32xf32>
    %257 = vector.extract_strided_slice %241 {offsets = [96, 0], sizes = [32, 96], strides = [1, 1]} : vector<144x96xf32> to vector<32x96xf32>
    %cst_131 = arith.constant dense<0.000000e+00> : vector<16x96xf32>
    %258 = tpu.matmul %256, %257, %cst_131 {dimension_numbers = #tpu.dot_dimension_numbers<[1], [0], [0], [1], [0, 0, 1, 1], [], []>} : vector<16x32xf32>, vector<32x96xf32>, vector<16x96xf32> -> vector<16x96xf32>
    %259 = arith.addf %255, %258 : vector<16x96xf32>
    %cst_132 = arith.constant 0.000000e+00 : f32
    %260 = vector.broadcast %cst_132 : f32 to vector<16x96xf32>
    %261 = arith.maximumf %259, %260 : vector<16x96xf32>
    %262 = vector.extract_strided_slice %261 {offsets = [0, 0], sizes = [8, 96], strides = [1, 1]} : vector<16x96xf32> to vector<8x96xf32>
    %cst_133 = arith.constant dense<0xFF800000> : vector<96xf32>
    %263 = vector.multi_reduction <maximumf>, %262, %cst_133 [0] : vector<8x96xf32> to vector<96xf32>
    %264 = vector.shape_cast %263 : vector<96xf32> to vector<1x96xf32>
    %265 = vector.extract_strided_slice %261 {offsets = [8, 0], sizes = [8, 96], strides = [1, 1]} : vector<16x96xf32> to vector<8x96xf32>
    %cst_134 = arith.constant dense<0xFF800000> : vector<96xf32>
    %266 = vector.multi_reduction <maximumf>, %265, %cst_134 [0] : vector<8x96xf32> to vector<96xf32>
    %267 = vector.shape_cast %266 : vector<96xf32> to vector<1x96xf32>
    %268 = tpu.concatenate %264, %267 in 0 : vector<1x96xf32>, vector<1x96xf32> -> vector<2x96xf32>
    %c0_135 = arith.constant 0 : index
    %c0_136 = arith.constant 0 : index
    %269 = vector.load %arg7[%c0_135, %c0_136] : memref<104x32xf32, #tpu.memory_space<vmem>>, vector<104x32xf32>
    %270 = vector.extract_strided_slice %269 {offsets = [0, 0], sizes = [96, 32], strides = [1, 1]} : vector<104x32xf32> to vector<96x32xf32>
    %cst_137 = arith.constant dense<0.000000e+00> : vector<2x32xf32>
    %271 = tpu.matmul %268, %270, %cst_137 {dimension_numbers = #tpu.dot_dimension_numbers<[1], [0], [0], [1], [0, 0, 1, 1], [], []>} : vector<2x96xf32>, vector<96x32xf32>, vector<2x32xf32> -> vector<2x32xf32>
    %272 = vector.extract_strided_slice %269 {offsets = [96, 0], sizes = [1, 32], strides = [1, 1]} : vector<104x32xf32> to vector<1x32xf32>
    %273 = vector.broadcast %272 : vector<1x32xf32> to vector<2x32xf32>
    %274 = arith.addf %271, %273 : vector<2x32xf32>
    %c0_138 = arith.constant 0 : index
    %c0_139 = arith.constant 0 : index
    %275 = vector.load %arg8[%c0_138, %c0_139] : memref<2x32xf32, #tpu.memory_space<vmem>>, vector<2x32xf32>
    tpu.vector_store %arg8[%c0_138, %c0_139], %274 {strides = array<i32>} : memref<2x32xf32, #tpu.memory_space<vmem>>, vector<2x32xf32>,
    return
  }
}

</mosaic_0001>

<bundles_post_ra>
// kernel: decoder_forward.1
= control target key start
LH: loop header
LB: loop body
LE: loop exit
PB: predicated region body
PF: predicated region fallthrough
CT: control target
= control target key end

     0   :  { %13 = vsyncpa [#allocation3], 0  ;;  %s3009_s0 = inlined_call_operand.vmem [shape: f32[16,32], index: 0, kind: input, shape index: {}]   ;;  %s3010_s1 = inlined_call_operand.hbm [shape: f32[16,32,32], index: 1, kind: input, shape index: {}]   ;;  %s3011_s2 = inlined_call_operand.vmem [shape: f32[2,40,64], index: 2, kind: input, shape index: {}]   ;;  %s3012_s3 = inlined_call_operand.vmem [shape: f32[2,40,32], index: 3, kind: input, shape index: {}]   ;;  %s3013_s4 = inlined_call_operand.vmem [shape: f32[2,40,32], index: 4, kind: input, shape index: {}]   ;;  %s3014_s5 = inlined_call_operand.vmem [shape: f32[144,16], index: 5, kind: input, shape index: {}]   ;;  %s3015_s6 = inlined_call_operand.vmem [shape: f32[144,96], index: 6, kind: input, shape index: {}]   ;;  %s3016_s7 = inlined_call_operand.vmem [shape: f32[104,32], index: 7, kind: input, shape index: {}]   ;;  %s3017_s8 = inlined_call_operand.hbm [shape: f32[2,32], index: 8, kind: output, shape index: {}]  }
   0x1   :  { %14 = vsyncpa [#allocation4], 0  ;;  %s21_s29 = sshll.u32 %s3010_s1, 4  ;;  %s2371_s30 = smov [#allocation2]   ;;  %s22_s29 = int_to_ptr.hbm [resolvable:$true] %s21_s29 }
   0x2   :  { %s23_s9 = sshll.u32 %s2371_s30, 4  ;;  %s2372_s10 = smov 128   ;;  %s24_s9 = int_to_ptr.vmem [resolvable:$true] %s23_s9 }
   0x3   :  { %s2373_s11 = smov 8  }
   0x4   :  { %29 = dma.hbm_to_vmem [thread:$0]  %s22_s29, 8192, %s24_s9, [#allocation3], %s2372_s10, %s2372_s10, %s2373_s11  }
   0x5   :  { %2367 = dma.done.wait [#allocation3], 8192  }
   0x6   :  { %2368 = vsyncadd [#allocation3], 4294959104  ;;  %v69_v0 = vld [vmem:[#allocation2 + $0x18] sm:$0xff]  ;;  %v68_v2 = vld [vmem:[#allocation2 + $0x10] sm:$0xff]  ;;  %vm70_vm0 = vcmask 261120   ;;  %vm420_vm1 = vcmask 130048  }
   0x7   :  { %v104_v1 = vld [vmem:[#allocation2 + $0x38] sm:$0xff]  ;;  %89 = vmatpush.msra.mxu0 %v69_v0  ;;  %v103_v3 = vld [vmem:[#allocation2 + $0x30] sm:$0xff]  ;;  %v67_v4 = vld [vmem:[#allocation2 + $0x8] sm:$0xff]  ;;  %2228 = vmatpush.msra.mxu3 %v69_v0  ;;  %s2374_s28 = smov 96   ;;  %s2375_s19 = smov [#allocation5]  }
   0x8   :  { %117 = vmatpush.msra.mxu1 %v104_v1  ;;  %v102_v5 = vld [vmem:[#allocation2 + $0x28] sm:$0xff]  ;;  %v66_v6 = vld [vmem:[#allocation2] sm:$0xff]  ;;  %v132_v9 = vld [vmem:[#allocation2 + $0x58] sm:$0xff]  ;;  %s2076_s20 = sshll.u32 %s2375_s19, 4  ;;  %s2078_s22 = sshll.u32 %s3017_s8, 4  ;;  %s2077_s20 = int_to_ptr.vmem [resolvable:$true] %s2076_s20  ;;  %s2079_s22 = int_to_ptr.hbm [resolvable:$true] %s2078_s22 }
   0x9   :  { %90 = vmatpush.msra.mxu0 %v68_v2  ;;  %v101_v7 = vld [vmem:[#allocation2 + $0x20] sm:$0xff]  ;;  %2229 = vmatpush.msra.mxu3 %v68_v2  ;;  %v188_v10 = vld [vmem:[#allocation2 + $0x98] sm:$0xff]  ;;  %v131_v11 = vld [vmem:[#allocation2 + $0x50] sm:$0xff] }
   0xa   :  { %118 = vmatpush.msra.mxu1 %v103_v3  ;;  %v2427_v8 = vld [vmem:[%s3009_s0] sm:$0xff]  ;;  %v160_v12 = vld [vmem:[#allocation2 + $0x78] sm:$0xff]  ;;  %v2436_v13 = vld [vmem:[%s3009_s0 + $0x8] sm:$0xff] }
   0xb   :  { %91 = vmatpush.msra.mxu0 %v67_v4  ;;  %2230 = vmatpush.msra.mxu3 %v67_v4  ;;  %v187_v14 = vld [vmem:[#allocation2 + $0x90] sm:$0xff]  ;;  %v244_v15 = vld [vmem:[#allocation2 + $0xd8] sm:$0xff]  ;;  %v130_v16 = vld [vmem:[#allocation2 + $0x48] sm:$0xff] }
   0xc   :  { %119 = vmatpush.msra.mxu1 %v102_v5  ;;  %v159_v17 = vld [vmem:[#allocation2 + $0x70] sm:$0xff]  ;;  %v186_v18 = vld [vmem:[#allocation2 + $0x88] sm:$0xff]  ;;  %v129_v20 = vld [vmem:[#allocation2 + $0x40] sm:$0xff]  ;;  %257 = vmatpush.msra.mxu2 %v244_v15 }
   0xd   :  { %92 = vmatpush.msra.mxu0 %v66_v6  ;;  %2231 = vmatpush.msra.mxu3 %v66_v6  ;;  %v243_v19 = vld [vmem:[#allocation2 + $0xd0] sm:$0xff]  ;;  %v158_v21 = vld [vmem:[#allocation2 + $0x68] sm:$0xff]  ;;  %v185_v22 = vld [vmem:[#allocation2 + $0x80] sm:$0xff] }
   0xe   :  { %120 = vmatpush.msra.mxu1 %v101_v7  ;;  %2088 = vmatmul.msk.f32.vlgmr.msra.gmra.mxu0 %vm70_vm0, %v2427_v8  ;;  %v157_v23 = vld [vmem:[#allocation2 + $0x60] sm:$0xff]  ;;  %v216_v24 = vld [vmem:[#allocation2 + $0xb8] sm:$0xff]  ;;  %v215_v25 = vld [vmem:[#allocation2 + $0xb0] sm:$0xff] }
   0xf   :  { %2090 = vmatmul.msk.f32.vlgmr.msra.gmra.mxu1 %vm70_vm0, %v2427_v8  ;;  %2089 = vmatmul.msk.f32.vlgmr.msra.gmra.mxu3 %vm70_vm0, %v2436_v13  ;;  %v242_v26 = vld [vmem:[#allocation2 + $0xc8] sm:$0xff]  ;;  %v272_v27 = vld [vmem:[#allocation2 + $0xf8] sm:$0xff]  ;;  %v241_v29 = vld [vmem:[#allocation2 + $0xc0] sm:$0xff] }
  0x10   :  { %145 = vmatpush.msrb.mxu1 %v132_v9  ;;  %201 = vmatpush.msrb.mxu0 %v188_v10  ;;  %v214_v28 = vld [vmem:[#allocation2 + $0xa8] sm:$0xff]  ;;  %v271_v30 = vld [vmem:[#allocation2 + $0xf0] sm:$0xff]  ;;  %v213_v31 = vld [vmem:[#allocation2 + $0xa0] sm:$0xff] }
  0x11   :  { %173 = vmatpush.msrb.mxu3 %v160_v12  ;;  %258 = vmatpush.msra.mxu2 %v243_v19  ;;  %v270_v32 = vld [vmem:[#allocation2 + $0xe8] sm:$0xff]  ;;  %v269_v33 = vld [vmem:[#allocation2 + $0xe0] sm:$0xff]  ;;  %v2493_v50 = vld [vmem:[%s3014_s5 + $0x50] sm:$0xff] }
  0x12   :  { %146 = vmatpush.msrb.mxu1 %v131_v11  ;;  %202 = vmatpush.msrb.mxu0 %v187_v14  ;;  %v2500_v55 = vld [vmem:[%s3014_s5 + $0x60] sm:$0xff]  ;;  %v2507_v58 = vld [vmem:[%s3014_s5 + $0x68] sm:$0xff]  ;;  %v2517_v62 = vld [vmem:[%s3014_s5 + $0x70] sm:$0xff] }
  0x13   :  { %174 = vmatpush.msrb.mxu3 %v159_v17  ;;  %259 = vmatpush.msra.mxu2 %v242_v26  ;;  %v2523_v2 = vld [vmem:[%s3014_s5 + $0x80] sm:$0xff]  ;;  %v2530_v5 = vld [vmem:[%s3014_s5 + $0x78] sm:$0xff]  ;;  %v2537_v10 = vld [vmem:[%s3014_s5 + $0x88] sm:$0xff] }
  0x14   :  { %147 = vmatpush.msrb.mxu1 %v130_v16  ;;  %203 = vmatpush.msrb.mxu0 %v186_v18  ;;  %v2543_v14 = vld [vmem:[%s3014_s5 + $0x58] sm:$0xff] }
  0x15   :  { %175 = vmatpush.msrb.mxu3 %v158_v21  ;;  %260 = vmatpush.msra.mxu2 %v241_v29 }
  0x16   :  { %148 = vmatpush.msrb.mxu1 %v129_v20  ;;  %204 = vmatpush.msrb.mxu0 %v185_v22 }
  0x17   :  { %2091 = vmatmul.msk.f32.gmra.mxu1 %vm70_vm0, %v2436_v13  ;;  %176 = vmatpush.msrb.mxu3 %v157_v23 }
  0x18   :  { %229 = vmatpush.msra.mxu1 %v216_v24  ;;  %2094 = vmatmul.msk.f32.vlgmr.msrb.gmra.mxu3 %vm70_vm0, %v2427_v8 }
  0x19   :  { %2096 = vmatmul.msk.f32.vlgmr.msrb.gmra.mxu0 %vm70_vm0, %v2427_v8  ;;  %285 = vmatpush.msra.mxu3 %v272_v27 }
  0x1a   :  { %230 = vmatpush.msra.mxu1 %v215_v25  ;;  %2104 = vmatpush.xpose.msk.msra.mxu0 %vm70_vm0, %v2436_v13 }
  0x1b   :  { %2100 = vmatmul.msk.f32.vlgmr.msra.gmra.mxu2 %vm70_vm0, %v2427_v8  ;;  %286 = vmatpush.msra.mxu3 %v271_v30 }
  0x1c   :  { %231 = vmatpush.msra.mxu1 %v214_v28  ;;  %2112 = vmatpush.xpose.msk.msrb.mxu2 %vm70_vm0, %v2436_v13 }
  0x1d   :  { %287 = vmatpush.msra.mxu3 %v270_v32 }
  0x1e   :  { %232 = vmatpush.msra.mxu1 %v213_v31  ;;  %2105 = vmatpush.xpose.msk.msra.mxu0 %vm70_vm0, %v2427_v8 }
  0x1f   :  { %2092 = vmatmul.msk.f32.vlgmr.msrb.gmra.mxu1 %vm70_vm0, %v2427_v8  ;;  %288 = vmatpush.msra.mxu3 %v269_v33 }
  0x20   :  { %2108 = vmatpush.xpose.msk.msrb.mxu1 %vm70_vm0, %v2436_v13  ;;  %2095 = vmatmul.msk.f32.gmra.mxu3 %vm70_vm0, %v2436_v13 }
  0x21   :  { %2097 = vmatmul.msk.f32.gmra.mxu0 %vm70_vm0, %v2436_v13  ;;  %2113 = vmatpush.xpose.msk.msrb.mxu2 %vm70_vm0, %v2427_v8 }
  0x22   :  { %2116 = vmatpush.xpose.msk.msrb.mxu3 %vm70_vm0, %v2436_v13 }
  0x23   :  { %2101 = vmatmul.msk.f32.gmra.mxu2 %vm70_vm0, %v2436_v13 }
  0x24   :  { %2109 = vmatpush.xpose.msk.msrb.mxu1 %vm70_vm0, %v2427_v8 }
  0x26   :  { %2117 = vmatpush.xpose.msk.msrb.mxu3 %vm70_vm0, %v2427_v8 }
  0x27   :  { %2093 = vmatmul.msk.f32.gmra.mxu1 %vm70_vm0, %v2436_v13 }
  0x28   :  { %2102 = vmatmul.msk.f32.vlgmr.msra.gmra.mxu3 %vm70_vm0, %v2427_v8 }
  0x2f   :  { %2098 = vmatmul.msk.f32.vlgmr.msra.gmra.mxu1 %vm70_vm0, %v2427_v8 }
  0x30   :  { %2103 = vmatmul.msk.f32.gmra.mxu3 %vm70_vm0, %v2436_v13 }
  0x37   :  { %2099 = vmatmul.msk.f32.gmra.mxu1 %vm70_vm0, %v2436_v13 }
  0x8b   :  { %v94_v34 = vpop.f32.mrf.mxu0 }
  0x8c   :  { %v122_v35 = vpop.f32.mrf.mxu1  ;;  %2106 = vmatmul.msk.f32.vlgmr.msra.gmra.mxu0 %vm70_vm0, %v94_v34 }
  0x8d   :  { %2110 = vmatmul.msk.f32.vlgmr.msrb.gmra.mxu1 %vm70_vm0, %v122_v35 }
  0x92   :  { %v97_v37 = vpop.f32.mrf.mxu3 }
  0x94   :  { %v125_v36 = vpop.f32.mrf.mxu1  ;;  %2107 = vmatmul.msk.f32.gmra.mxu0 %vm70_vm0, %v97_v37 }
  0x95   :  { %2111 = vmatmul.msk.f32.gmra.mxu1 %vm70_vm0, %v125_v36 }
  0x96   :  { %v206_v38 = vpop.f32.mrf.mxu0 }
  0x9b   :  { %v178_v40 = vpop.f32.mrf.mxu3 }
  0x9c   :  { %v150_v39 = vpop.f32.mrf.mxu1  ;;  %2118 = vmatmul.msk.f32.vlgmr.msrb.gmra.mxu3 %vm70_vm0, %v178_v40 }
  0x9d   :  { %2114 = vmatmul.msk.f32.vlgmr.msrb.gmra.mxu2 %vm70_vm0, %v150_v39 }
  0x9e   :  { %v209_v41 = vpop.f32.mrf.mxu0  ;;  %v262_v46 = vpop.f32.mrf.mxu2 }
  0x9f   :  { %558 = vmatpush.msra.mxu1 %v209_v41 }
  0xa1   :  { %559 = vmatpush.msra.mxu1 %v206_v38 }
  0xa3   :  { %v181_v43 = vpop.f32.mrf.mxu3 }
  0xa4   :  { %v153_v42 = vpop.f32.mrf.mxu1  ;;  %2119 = vmatmul.msk.f32.gmra.mxu3 %vm70_vm0, %v181_v43 }
  0xa5   :  { %2115 = vmatmul.msk.f32.gmra.mxu2 %vm70_vm0, %v153_v42 }
  0xa6   :  { %v265_v47 = vpop.f32.mrf.mxu2 }
  0xa7   :  { %587 = vmatpush.msra.mxu2 %v265_v47 }
  0xa9   :  { %588 = vmatpush.msra.mxu2 %v262_v46 }
  0xab   :  { %v290_v48 = vpop.f32.mrf.mxu3 }
  0xac   :  { %v234_v44 = vpop.f32.mrf.mxu1 }
  0xb3   :  { %v293_v49 = vpop.f32.mrf.mxu3 }
  0xb4   :  { %v237_v45 = vpop.f32.mrf.mxu1  ;;  %618 = vmatpush.msra.mxu3 %v293_v49 }
  0xb5   :  { %529 = vmatpush.msrb.mxu0 %v237_v45 }
  0xb6   :  { %619 = vmatpush.msra.mxu3 %v290_v48 }
  0xb7   :  { %530 = vmatpush.msrb.mxu0 %v234_v44 }
 0x109   :  { %v319_v51 = vpop.f32.mrf.mxu0 }
 0x10a   :  { %v412_v52 = vadd.f32 %v319_v51, %v2493_v50  ;;  %v348_v53 = vpop.f32.mrf.mxu1 }
 0x10b   :  { %v414_v56 = vadd.f32 %v348_v53, %v2500_v55 }
 0x10c   :  { %v421_v54 = vsel %vm420_vm1, %v412_v52, -inf }
 0x10d   :  { %422 = vmax.xlane.f32.xlu1 %v421_v54  ;;  %v427_v57 = vsel %vm420_vm1, %v414_v56, -inf }
 0x111   :  { %v322_v15 = vpop.f32.mrf.mxu0 }
 0x112   :  { %v351_v59 = vpop.f32.mrf.mxu1  ;;  %v413_v17 = vadd.f32 %v322_v15, %v2543_v14 }
 0x113   :  { %v2510_v60 = vadd.f32 %v351_v59, %v2507_v58 }
 0x114   :  { %v424_v19 = vsel %vm420_vm1, %v413_v17, -inf }
 0x115   :  { %428 = vmax.xlane.f32.xlu1 %v427_v57  ;;  %v430_v61 = vsel %vm420_vm1, %v2510_v60, -inf }
 0x11d   :  { %431 = vmax.xlane.f32.xlu1 %v430_v61 }
 0x11f   :  { %v406_v0 = vpop.f32.mrf.mxu3 }
 0x120   :  { %v377_v63 = vpop.f32.mrf.mxu2  ;;  %v418_v4 = vadd.f32 %v406_v0, %v2523_v2 }
 0x121   :  { %v416_v1 = vadd.f32 %v377_v63, %v2517_v62 }
 0x122   :  { %v439_v7 = vsel %vm420_vm1, %v418_v4, -inf }
 0x123   :  { %v433_v3 = vsel %vm420_vm1, %v416_v1, -inf }
 0x124   :  { %434 = vmax.xlane.f32.xlu0 %v433_v3 }
 0x127   :  { %v409_v11 = vpop.f32.mrf.mxu3 }
 0x128   :  { %v380_v6 = vpop.f32.mrf.mxu2  ;;  %v419_v16 = vadd.f32 %v409_v11, %v2537_v10 }
 0x129   :  { %v417_v9 = vadd.f32 %v380_v6, %v2530_v5 }
 0x12a   :  { %v442_v18 = vsel %vm420_vm1, %v419_v16, -inf }
 0x12b   :  { %v436_v12 = vsel %vm420_vm1, %v417_v9, -inf }
 0x12c   :  { %440 = vmax.xlane.f32.xlu0 %v439_v7  ;;  %437 = vmax.xlane.f32.xlu2 %v436_v12 }
 0x134   :  { %443 = vmax.xlane.f32.xlu2 %v442_v18  ;;  %425 = vmax.xlane.f32.xlu0 %v424_v19 }
 0x180   :  { %v423_v20 = vpop.xlane.xlu1 %422 }
 0x181   :  { %v445_v21 = vsub.f32 %v412_v52, %v423_v20 }
 0x183   :  { %v453_v22 = vmul.f32 1.442695, %v445_v21 }
 0x185   :  { %2237 = vpow2.f32 %v453_v22 }
 0x188   :  { %v429_v25 = vpop.xlane.xlu1 %428 }
 0x189   :  { %v447_v28 = vsub.f32 %v414_v56, %v429_v25 }
 0x18b   :  { %v2238_v23 = vpop.eup %2237  ;;  %v457_v30 = vmul.f32 1.442695, %v447_v28 }
 0x18c   :  { %v469_v24 = vsel %vm420_vm1, %v2238_v23, 0.0 }
 0x18d   :  { %470 = vadd.xlane.f32.xlu1 %v469_v24 }
 0x190   :  { %v432_v38 = vpop.xlane.xlu1 %431 }
 0x191   :  { %v448_v46 = vsub.f32 %v2510_v60, %v432_v38 }
 0x193   :  { %v459_v52 = vmul.f32 1.442695, %v448_v46 }
 0x197   :  { %v435_v26 = vpop.xlane.xlu0 %434 }
 0x198   :  { %v449_v27 = vsub.f32 %v416_v1, %v435_v26 }
 0x19a   :  { %v461_v29 = vmul.f32 1.442695, %v449_v27 }
 0x19c   :  { %2239 = vpow2.f32 %v461_v29 }
 0x19d   :  { %2241 = vpow2.f32 %v457_v30 }
 0x19f   :  { %v441_v31 = vpop.xlane.xlu0 %440  ;;  %v438_v32 = vpop.xlane.xlu2 %437 }
 0x1a0   :  { %v451_v33 = vsub.f32 %v418_v4, %v441_v31  ;;  %v450_v36 = vsub.f32 %v417_v9, %v438_v32 }
 0x1a2   :  { %v2240_v34 = vpop.eup %2239  ;;  %v465_v35 = vmul.f32 1.442695, %v451_v33  ;;  %v463_v39 = vmul.f32 1.442695, %v450_v36 }
 0x1a3   :  { %v481_v37 = vsel %vm420_vm1, %v2240_v34, 0.0  ;;  %v2242_v42 = vpop.eup %2241 }
 0x1a4   :  { %2243 = vpow2.f32 %v465_v35  ;;  %482 = vadd.xlane.f32.xlu2 %v481_v37  ;;  %v475_v49 = vsel %vm420_vm1, %v2242_v42, 0.0 }
 0x1a5   :  { %2245 = vpow2.f32 %v463_v39 }
 0x1a7   :  { %v444_v40 = vpop.xlane.xlu2 %443  ;;  %v426_v41 = vpop.xlane.xlu0 %425 }
 0x1a8   :  { %v452_v43 = vsub.f32 %v419_v16, %v444_v40  ;;  %v446_v44 = vsub.f32 %v413_v17, %v426_v41 }
 0x1aa   :  { %v2244_v45 = vpop.eup %2243  ;;  %v467_v47 = vmul.f32 1.442695, %v452_v43  ;;  %v455_v48 = vmul.f32 1.442695, %v446_v44 }
 0x1ab   :  { %v487_v51 = vsel %vm420_vm1, %v2244_v45, 0.0  ;;  %v2246_v53 = vpop.eup %2245 }
 0x1ac   :  { %2247 = vpow2.f32 %v467_v47  ;;  %476 = vadd.xlane.f32.xlu2 %v475_v49  ;;  %488 = vadd.xlane.f32.xlu0 %v487_v51  ;;  %v484_v59 = vsel %vm420_vm1, %v2246_v53, 0.0  ;;  %v2578_v47 = vld [vmem:[%s3014_s5 + $0x40] sm:$0xff] }
 0x1ad   :  { %2249 = vpow2.f32 %v455_v48 }
 0x1ae   :  { %2251 = vpow2.f32 %v459_v52 }
 0x1b2   :  { %v2248_v54 = vpop.eup %2247 }
 0x1b3   :  { %v2250_v56 = vpop.eup %2249  ;;  %v490_v57 = vsel %vm420_vm1, %v2248_v54, 0.0 }
 0x1b4   :  { %491 = vadd.xlane.f32.xlu1 %v490_v57  ;;  %485 = vadd.xlane.f32.xlu0 %v484_v59  ;;  %v472_v60 = vsel %vm420_vm1, %v2250_v56, 0.0  ;;  %v2252_v61 = vpop.eup %2251  ;;  %v734_v59 = vld [vmem:[%s3011_s2 + $0x18] sm:$0xff] }
 0x1b5   :  { %473 = vadd.xlane.f32.xlu2 %v472_v60  ;;  %v478_v63 = vsel %vm420_vm1, %v2252_v61, 0.0  ;;  %755 = vmatpush.msrb.mxu2 %v734_v59  ;;  %v733_v60 = vld [vmem:[%s3011_s2 + $0x10] sm:$0xff] }
 0x1b7   :  { %756 = vmatpush.msrb.mxu2 %v733_v60 }
 0x1bc   :  { %479 = vadd.xlane.f32.xlu0 %v478_v63  ;;  %v731_v63 = vld [vmem:[%s3011_s2] sm:$0xff] }
 0x200   :  { %v471_v0 = vpop.xlane.xlu1 %470 }
 0x201   :  { %2253 = vrcp.f32 %v471_v0 }
 0x207   :  { %v2254_v1 = vpop.eup %2253 }
 0x208   :  { %v501_v3 = vmul.f32 %v2254_v1, %v2238_v23 }
 0x20a   :  { %2122 = vmatmul.msk.f32.vlgmr.msra.gmra.mxu1 %vm420_vm1, %v501_v3 }
 0x217   :  { %v483_v4 = vpop.xlane.xlu2 %482 }
 0x218   :  { %2255 = vrcp.f32 %v483_v4 }
 0x21e   :  { %v2256_v6 = vpop.eup %2255 }
 0x21f   :  { %v505_v7 = vmul.f32 %v2256_v6, %v2240_v34  ;;  %v477_v9 = vpop.xlane.xlu2 %476  ;;  %v489_v11 = vpop.xlane.xlu0 %488 }
 0x220   :  { %2257 = vrcp.f32 %v477_v9 }
 0x221   :  { %2259 = vrcp.f32 %v489_v11  ;;  %2124 = vmatmul.msk.f32.vlgmr.msra.gmra.mxu2 %vm420_vm1, %v505_v7 }
 0x226   :  { %v2258_v12 = vpop.eup %2257 }
 0x227   :  { %v2260_v15 = vpop.eup %2259  ;;  %v503_v16 = vmul.f32 %v2258_v12, %v2242_v42  ;;  %v492_v17 = vpop.xlane.xlu1 %491 }
 0x228   :  { %v486_v18 = vpop.xlane.xlu0 %485  ;;  %v507_v19 = vmul.f32 %v2260_v15, %v2244_v45  ;;  %2261 = vrcp.f32 %v492_v17  ;;  %v474_v20 = vpop.xlane.xlu2 %473 }
 0x229   :  { %2263 = vrcp.f32 %v474_v20  ;;  %2120 = vmatmul.msk.f32.vlgmr.msrb.gmra.mxu0 %vm420_vm1, %v503_v16 }
 0x22a   :  { %2265 = vrcp.f32 %v486_v18  ;;  %2126 = vmatmul.msk.f32.vlgmr.msra.gmra.mxu3 %vm420_vm1, %v507_v19 }
 0x22e   :  { %v2262_v21 = vpop.eup %2261 }
 0x22f   :  { %v2264_v22 = vpop.eup %2263  ;;  %v508_v24 = vmul.f32 %v2262_v21, %v2248_v54 }
 0x230   :  { %v480_v23 = vpop.xlane.xlu0 %479  ;;  %v2266_v25 = vpop.eup %2265  ;;  %v502_v26 = vmul.f32 %v2264_v22, %v2250_v56 }
 0x231   :  { %2267 = vrcp.f32 %v480_v23  ;;  %v506_v27 = vmul.f32 %v2266_v25, %v2246_v53 }
 0x232   :  { %2123 = vmatmul.msk.f32.gmra.mxu1 %vm420_vm1, %v502_v26  ;;  %2127 = vmatmul.msk.f32.gmra.mxu3 %vm420_vm1, %v508_v24 }
 0x233   :  { %2125 = vmatmul.msk.f32.gmra.mxu2 %vm420_vm1, %v506_v27 }
 0x237   :  { %v2268_v28 = vpop.eup %2267 }
 0x238   :  { %v504_v29 = vmul.f32 %v2268_v28, %v2252_v61  ;;  %v732_v61 = vld [vmem:[%s3011_s2 + $0x8] sm:$0xff] }
 0x239   :  { %757 = vmatpush.msrb.mxu2 %v732_v61 }
 0x23a   :  { %2121 = vmatmul.msk.f32.gmra.mxu0 %vm420_vm1, %v504_v29 }
 0x23b   :  { %758 = vmatpush.msrb.mxu2 %v731_v63 }
 0x287   :  { %v561_v30 = vpop.f32.mrf.mxu1 }
 0x2a4   :  { %v590_v32 = vpop.f32.mrf.mxu2 }
 0x2a6   :  { %v532_v31 = vpop.f32.mrf.mxu0 }
 0x2a7   :  { %v562_v34 = vadd.f32 %v561_v30, %v532_v31 }
 0x2a9   :  { %v596_v37 = vadd.f32 %v590_v32, %v562_v34 }
 0x2ad   :  { %v621_v33 = vpop.f32.mrf.mxu3 }
 0x2ae   :  { %v627_v40 = vadd.f32 %v621_v33, %v596_v37 }
 0x2af   :  { %v564_v35 = vpop.f32.mrf.mxu1 }
 0x2b0   :  { %v2567_v44 = vadd.f32 %v627_v40, %v2427_v8  ;;  %v769_v40 = vld [vmem:[%s3012_s3 + $0x8] sm:$0xff] }
 0x2b2   :  { %v666_v8 = vmul.f32 %v2567_v44, %v2567_v44 }
 0x2b5   :  { %v624_v42 = vpop.f32.mrf.mxu3 }
 0x2b6   :  { %v593_v39 = vpop.f32.mrf.mxu2 }
 0x2b7   :  { %v535_v36 = vpop.f32.mrf.mxu0 }
 0x2b8   :  { %v565_v38 = vadd.f32 %v564_v35, %v535_v36 }
 0x2ba   :  { %v597_v41 = vadd.f32 %v593_v39, %v565_v38  ;;  %v771_v38 = vld [vmem:[%s3012_s3 + $0x18] sm:$0xff]  ;;  %v770_v39 = vld [vmem:[%s3012_s3 + $0x10] sm:$0xff] }
 0x2bb   :  { %796 = vmatpush.msrb.mxu3 %v771_v38 }
 0x2bc   :  { %v628_v43 = vadd.f32 %v624_v42, %v597_v41  ;;  %v768_v41 = vld [vmem:[%s3012_s3] sm:$0xff] }
 0x2bd   :  { %797 = vmatpush.msrb.mxu3 %v770_v39  ;;  %v735_v42 = vld [vmem:[%s3011_s2 + $0x20] sm:$0xff] }
 0x2be   :  { %v2570_v45 = vadd.f32 %v628_v43, %v2436_v13  ;;  %v2590_v13 = vld [vmem:[%s3014_s5 + $0x48] sm:$0xff]  ;;  %v736_v43 = vperm.slane %v735_v42, 0 }
 0x2bf   :  { %798 = vmatpush.msrb.mxu3 %v769_v40 }
 0x2c0   :  { %651 = vmatpush.msra.mxu0 %v2570_v45  ;;  %v667_v46 = vmul.f32 %v2570_v45, %v2570_v45 }
 0x2c1   :  { %799 = vmatpush.msrb.mxu3 %v768_v41 }
 0x2c2   :  { %652 = vmatpush.msra.mxu0 %v2567_v44  ;;  %682 = vmatpush.msrb.mxu1 %v667_v46 }
 0x2c3   :  { %2128 = vmatmul.msk.f32.vlgmr.msra.gmra.mxu0 %vm420_vm1, %v2578_v47 }
 0x2c4   :  { %683 = vmatpush.msrb.mxu1 %v666_v8 }
 0x2c5   :  { %2130 = vmatmul.msk.f32.vlgmr.msrb.gmra.mxu1 %vm420_vm1, %v2578_v47 }
 0x2cb   :  { %2129 = vmatmul.msk.f32.gmra.mxu0 %vm420_vm1, %v2590_v13 }
 0x2cd   :  { %2131 = vmatmul.msk.f32.gmra.mxu1 %vm420_vm1, %v2590_v13 }
 0x340   :  { %v654_v48 = vpop.f32.mrf.mxu0 }
 0x341   :  { %v660_v49 = vsel %vm70_vm0, %v654_v48, 0.0 }
 0x342   :  { %v685_v51 = vpop.f32.mrf.mxu1  ;;  %661 = vadd.xlane.f32.xlu1 %v660_v49 }
 0x343   :  { %v691_v52 = vsel %vm70_vm0, %v685_v51, 0.0 }
 0x344   :  { %692 = vadd.xlane.f32.xlu2 %v691_v52 }
 0x348   :  { %v657_v53 = vpop.f32.mrf.mxu0 }
 0x349   :  { %v663_v54 = vsel %vm70_vm0, %v657_v53, 0.0  ;;  %v772_v53 = vld [vmem:[%s3012_s3 + $0x20] sm:$0xff] }
 0x34a   :  { %v688_v56 = vpop.f32.mrf.mxu1  ;;  %664 = vadd.xlane.f32.xlu0 %v663_v54 }
 0x34b   :  { %v694_v57 = vsel %vm70_vm0, %v688_v56, 0.0  ;;  %v773_v56 = vperm.slane %v772_v53, 0 }
 0x34c   :  { %695 = vadd.xlane.f32.xlu1 %v694_v57 }
 0x3b5   :  { %v662_v0 = vpop.xlane.xlu1 %661 }
 0x3b6   :  { %v697_v1 = vmul.f32 0.00390625, %v662_v0 }
 0x3b7   :  { %v693_v3 = vpop.xlane.xlu2 %692 }
 0x3b8   :  { %v701_v4 = vmul.f32 %v697_v1, %v697_v1  ;;  %v699_v6 = vmul.f32 0.00390625, %v693_v3  ;;  %v705_v28 = vsub.f32 %v2567_v44, %v697_v1 }
 0x3ba   :  { %v703_v7 = vsub.f32 %v699_v6, %v701_v4 }
 0x3bc   :  { %v707_v9 = vadd.f32 1e-05, %v703_v7 }
 0x3bd   :  { %v665_v11 = vpop.xlane.xlu0 %664 }
 0x3be   :  { %2269 = vrsqrt.f32 %v707_v9  ;;  %v698_v12 = vmul.f32 0.00390625, %v665_v11  ;;  %vm715_vm3 = vweird.f32 %v707_v9 }
 0x3bf   :  { %v696_v15 = vpop.xlane.xlu1 %695 }
 0x3c0   :  { %v702_v16 = vmul.f32 %v698_v12, %v698_v12  ;;  %v700_v17 = vmul.f32 0.00390625, %v696_v15  ;;  %v706_v35 = vsub.f32 %v2570_v45, %v698_v12 }
 0x3c2   :  { %v704_v18 = vsub.f32 %v700_v17, %v702_v16  ;;  %v906_v16 = vld [vmem:[%s3013_s4 + $0x18] sm:$0xff]  ;;  %v905_v17 = vld [vmem:[%s3013_s4 + $0x10] sm:$0xff] }
 0x3c3   :  { %927 = vmatpush.msra.mxu2 %v906_v16  ;;  %v1116_v16 = vld [vmem:[#allocation2 + $0x1d8] sm:$0xff] }
 0x3c4   :  { %v2270_v19 = vpop.eup %2269  ;;  %v708_v20 = vadd.f32 1e-05, %v704_v18 }
 0x3c5   :  { %v710_v21 = vmul.f32 %v2270_v19, %v707_v9  ;;  %vm716_vm2 = vweird.f32 %v2270_v19  ;;  %928 = vmatpush.msra.mxu2 %v905_v17  ;;  %v1144_v17 = vld [vmem:[#allocation2 + $0x1f8] sm:$0xff] }
 0x3c6   :  { %2271 = vrsqrt.f32 %v708_v20  ;;  %vm717_vm4 = vmor %vm715_vm3, %vm716_vm2  ;;  %vm725_vm6 = vweird.f32 %v708_v20 }
 0x3c7   :  { %v711_v22 = vmul.f32 %v2270_v19, %v710_v21 }
 0x3c9   :  { %v712_v23 = vmul.f32 0.5, %v711_v22 }
 0x3cb   :  { %v713_v24 = vsub.f32 1.5, %v712_v23 }
 0x3cc   :  { %v2272_v25 = vpop.eup %2271 }
 0x3cd   :  { %v714_v26 = vmul.f32 %v2270_v19, %v713_v24  ;;  %v720_v27 = vmul.f32 %v2272_v25, %v708_v20  ;;  %vm726_vm5 = vweird.f32 %v2272_v25  ;;  %v903_v20 = vld [vmem:[%s3013_s4] sm:$0xff] }
 0x3ce   :  { %vm727_vm7 = vmor %vm725_vm6, %vm726_vm5 }
 0x3cf   :  { %v718_v29 = vsel %vm717_vm4, %v2270_v19, %v714_v26  ;;  %v721_v30 = vmul.f32 %v2272_v25, %v720_v27  ;;  %v904_v19 = vld [vmem:[%s3013_s4 + $0x8] sm:$0xff]  ;;  %v942_v27 = vld [vmem:[#allocation2 + $0x118] sm:$0xff] }
 0x3d0   :  { %v729_v31 = vmul.f32 %v718_v29, %v705_v28  ;;  %929 = vmatpush.msra.mxu2 %v904_v19  ;;  %v976_v28 = vld [vmem:[#allocation2 + $0x138] sm:$0xff]  ;;  %961 = vmatpush.msra.mxu3 %v942_v27  ;;  %v1087_v19 = vld [vmem:[#allocation2 + $0x1b0] sm:$0xff]  ;;  %v1085_v27 = vld [vmem:[#allocation2 + $0x1a0] sm:$0xff] }
 0x3d1   :  { %v722_v32 = vmul.f32 0.5, %v721_v30  ;;  %v1004_v29 = vld [vmem:[#allocation2 + $0x158] sm:$0xff] }
 0x3d2   :  { %2132 = vmatmul.msk.f32.vlgmr.msrb.gmra.mxu2 %vm70_vm0, %v729_v31  ;;  %v1032_v31 = vld [vmem:[#allocation2 + $0x178] sm:$0xff] }
 0x3d3   :  { %v723_v33 = vsub.f32 1.5, %v722_v32  ;;  %930 = vmatpush.msra.mxu2 %v903_v20  ;;  %v941_v32 = vld [vmem:[#allocation2 + $0x110] sm:$0xff] }
 0x3d4   :  { %962 = vmatpush.msra.mxu3 %v941_v32  ;;  %v1115_v20 = vld [vmem:[#allocation2 + $0x1d0] sm:$0xff] }
 0x3d5   :  { %v724_v34 = vmul.f32 %v2272_v25, %v723_v33  ;;  %v975_v33 = vld [vmem:[#allocation2 + $0x130] sm:$0xff]  ;;  %1045 = vmatpush.msrb.mxu2 %v1032_v31 }
 0x3d7   :  { %v728_v36 = vsel %vm727_vm7, %v2272_v25, %v724_v34  ;;  %v1003_v34 = vld [vmem:[#allocation2 + $0x150] sm:$0xff] }
 0x3d8   :  { %v730_v37 = vmul.f32 %v728_v36, %v706_v35  ;;  %v1031_v35 = vld [vmem:[#allocation2 + $0x170] sm:$0xff] }
 0x3d9   :  { %1046 = vmatpush.msrb.mxu2 %v1031_v35 }
 0x3da   :  { %2133 = vmatmul.msk.f32.gmra.mxu2 %vm70_vm0, %v730_v37 }
 0x455   :  { %v760_v44 = vpop.f32.mrf.mxu2 }
 0x456   :  { %v761_v45 = vadd.f32 %v760_v44, %v736_v43 }
 0x458   :  { %v766_v46 = vmax.f32 %v761_v45, 0.0 }
 0x45a   :  { %776 = vrot.lane.b32.xlu2 %v766_v46, %s2374_s28 }
 0x45d   :  { %v763_v8 = vpop.f32.mrf.mxu2 }
 0x45e   :  { %v764_v48 = vadd.f32 %v763_v8, %v736_v43 }
 0x460   :  { %v767_v49 = vmax.f32 %v764_v48, 0.0 }
 0x462   :  { %778 = vrot.lane.b32.xlu0 %v767_v49, %s2374_s28 }
 0x4b4   :  { %v777_v51 = vpop.permute.xlu2 %776 }
 0x4b5   :  { %2134 = vmatmul.msk.f32.vlgmr.msrb.gmra.mxu3 %vm70_vm0, %v777_v51 }
 0x4d4   :  { %v779_v52 = vpop.permute.xlu0 %778 }
 0x4d5   :  { %2135 = vmatmul.msk.f32.gmra.mxu3 %vm70_vm0, %v779_v52 }
 0x538   :  { %v801_v54 = vpop.f32.mrf.mxu3 }
 0x539   :  { %v802_v57 = vadd.f32 %v801_v54, %v773_v56 }
 0x53b   :  { %v2638_v61 = vadd.f32 %v802_v57, %v761_v45 }
 0x53d   :  { %v838_v1 = vmul.f32 %v2638_v61, %v2638_v61 }
 0x558   :  { %v804_v59 = vpop.f32.mrf.mxu3 }
 0x559   :  { %v805_v60 = vadd.f32 %v804_v59, %v773_v56 }
 0x55b   :  { %v2640_v63 = vadd.f32 %v805_v60, %v764_v48 }
 0x55d   :  { %v839_v0 = vmul.f32 %v2640_v63, %v2640_v63  ;;  %823 = vmatpush.msrb.mxu0 %v2640_v63 }
 0x55f   :  { %824 = vmatpush.msrb.mxu0 %v2638_v61  ;;  %854 = vmatpush.msra.mxu1 %v839_v0 }
 0x560   :  { %2136 = vmatmul.msk.f32.vlgmr.msrb.gmra.mxu0 %vm420_vm1, %v2578_v47 }
 0x561   :  { %855 = vmatpush.msra.mxu1 %v838_v1  ;;  %989 = vmatpush.msra.mxu0 %v976_v28  ;;  %v1113_v28 = vld [vmem:[#allocation2 + $0x1c0] sm:$0xff] }
 0x562   :  { %2138 = vmatmul.msk.f32.vlgmr.msra.gmra.mxu1 %vm420_vm1, %v2578_v47 }
 0x563   :  { %1017 = vmatpush.msrb.mxu1 %v1004_v29  ;;  %990 = vmatpush.msra.mxu0 %v975_v33  ;;  %v1141_v29 = vld [vmem:[#allocation2 + $0x1e0] sm:$0xff] }
 0x565   :  { %1018 = vmatpush.msrb.mxu1 %v1003_v34 }
 0x568   :  { %2137 = vmatmul.msk.f32.gmra.mxu0 %vm420_vm1, %v2590_v13 }
 0x56a   :  { %2139 = vmatmul.msk.f32.gmra.mxu1 %vm420_vm1, %v2590_v13 }
 0x5dd   :  { %v826_v3 = vpop.f32.mrf.mxu0 }
 0x5de   :  { %v832_v4 = vsel %vm70_vm0, %v826_v3, 0.0  ;;  %v974_v3 = vld [vmem:[#allocation2 + $0x128] sm:$0xff] }
 0x5df   :  { %833 = vadd.xlane.f32.xlu1 %v832_v4  ;;  %v857_v6 = vpop.f32.mrf.mxu1  ;;  %v1002_v4 = vld [vmem:[#allocation2 + $0x148] sm:$0xff]  ;;  %991 = vmatpush.msra.mxu0 %v974_v3 }
 0x5e0   :  { %v863_v7 = vsel %vm70_vm0, %v857_v6, 0.0  ;;  %v1030_v6 = vld [vmem:[#allocation2 + $0x168] sm:$0xff]  ;;  %1019 = vmatpush.msrb.mxu1 %v1002_v4 }
 0x5e1   :  { %1047 = vmatpush.msrb.mxu2 %v1030_v6 }
 0x5e5   :  { %v829_v12 = vpop.f32.mrf.mxu0 }
 0x5e6   :  { %v835_v15 = vsel %vm70_vm0, %v829_v12, 0.0  ;;  %v1029_v12 = vld [vmem:[#allocation2 + $0x160] sm:$0xff] }
 0x5e7   :  { %864 = vadd.xlane.f32.xlu1 %v863_v7  ;;  %v860_v9 = vpop.f32.mrf.mxu1  ;;  %v939_v7 = vld [vmem:[#allocation2 + $0x100] sm:$0xff]  ;;  %1048 = vmatpush.msrb.mxu2 %v1029_v12 }
 0x5e8   :  { %v866_v11 = vsel %vm70_vm0, %v860_v9, 0.0  ;;  %v973_v9 = vld [vmem:[#allocation2 + $0x120] sm:$0xff] }
 0x5e9   :  { %867 = vadd.xlane.f32.xlu2 %v866_v11  ;;  %v1001_v11 = vld [vmem:[#allocation2 + $0x140] sm:$0xff]  ;;  %992 = vmatpush.msra.mxu0 %v973_v9 }
 0x5ea   :  { %1020 = vmatpush.msrb.mxu1 %v1001_v11 }
 0x5ec   :  { %1129 = vmatpush.msra.mxu1 %v1116_v16 }
 0x5ee   :  { %1130 = vmatpush.msra.mxu1 %v1115_v20 }
 0x5ef   :  { %836 = vadd.xlane.f32.xlu1 %v835_v15  ;;  %v1088_v15 = vld [vmem:[#allocation2 + $0x1b8] sm:$0xff] }
 0x5f0   :  { %1101 = vmatpush.msrb.mxu0 %v1088_v15 }
 0x5f2   :  { %1102 = vmatpush.msrb.mxu0 %v1087_v19 }
 0x652   :  { %v834_v18 = vpop.xlane.xlu1 %833 }
 0x653   :  { %v869_v21 = vmul.f32 0.00390625, %v834_v18  ;;  %v1059_v18 = vld [vmem:[#allocation2 + $0x190] sm:$0xff] }
 0x655   :  { %v873_v23 = vmul.f32 %v869_v21, %v869_v21  ;;  %v877_v49 = vsub.f32 %v2638_v61, %v869_v21  ;;  %v940_v61 = vld [vmem:[#allocation2 + $0x108] sm:$0xff]  ;;  %v1143_v21 = vld [vmem:[#allocation2 + $0x1f0] sm:$0xff] }
 0x656   :  { %963 = vmatpush.msra.mxu3 %v940_v61 }
 0x658   :  { %964 = vmatpush.msra.mxu3 %v939_v7 }
 0x65a   :  { %v865_v22 = vpop.xlane.xlu1 %864 }
 0x65b   :  { %v871_v24 = vmul.f32 0.00390625, %v865_v22  ;;  %v1058_v22 = vld [vmem:[#allocation2 + $0x188] sm:$0xff] }
 0x65c   :  { %v868_v30 = vpop.xlane.xlu2 %867 }
 0x65d   :  { %v875_v25 = vsub.f32 %v871_v24, %v873_v23  ;;  %v872_v38 = vmul.f32 0.00390625, %v868_v30  ;;  %v1086_v23 = vld [vmem:[#allocation2 + $0x1a8] sm:$0xff]  ;;  %v907_v30 = vld [vmem:[%s3013_s4 + $0x20] sm:$0xff] }
 0x65e   :  { %v1114_v24 = vld [vmem:[#allocation2 + $0x1c8] sm:$0xff]  ;;  %1103 = vmatpush.msrb.mxu0 %v1086_v23  ;;  %v908_v31 = vperm.slane %v907_v30, 0 }
 0x65f   :  { %v879_v26 = vadd.f32 1e-05, %v875_v25  ;;  %v1142_v25 = vld [vmem:[#allocation2 + $0x1e8] sm:$0xff]  ;;  %1131 = vmatpush.msra.mxu1 %v1114_v24 }
 0x660   :  { %1104 = vmatpush.msrb.mxu0 %v1085_v27 }
 0x661   :  { %2273 = vrsqrt.f32 %v879_v26  ;;  %vm887_vm9 = vweird.f32 %v879_v26  ;;  %1132 = vmatpush.msra.mxu1 %v1113_v28 }
 0x662   :  { %v837_v36 = vpop.xlane.xlu1 %836 }
 0x663   :  { %v870_v37 = vmul.f32 0.00390625, %v837_v36 }
 0x665   :  { %v874_v39 = vmul.f32 %v870_v37, %v870_v37  ;;  %v878_v60 = vsub.f32 %v2640_v63, %v870_v37  ;;  %v1060_v63 = vld [vmem:[#allocation2 + $0x198] sm:$0xff] }
 0x666   :  { %1073 = vmatpush.msrb.mxu3 %v1060_v63 }
 0x667   :  { %v2274_v40 = vpop.eup %2273  ;;  %v876_v41 = vsub.f32 %v872_v38, %v874_v39 }
 0x668   :  { %v882_v42 = vmul.f32 %v2274_v40, %v879_v26  ;;  %vm888_vm8 = vweird.f32 %v2274_v40  ;;  %1074 = vmatpush.msrb.mxu3 %v1059_v18  ;;  %v1057_v26 = vld [vmem:[#allocation2 + $0x180] sm:$0xff] }
 0x669   :  { %v880_v43 = vadd.f32 1e-05, %v876_v41  ;;  %vm889_vm10 = vmor %vm887_vm9, %vm888_vm8 }
 0x66a   :  { %v883_v44 = vmul.f32 %v2274_v40, %v882_v42  ;;  %1075 = vmatpush.msrb.mxu3 %v1058_v22 }
 0x66b   :  { %2275 = vrsqrt.f32 %v880_v43  ;;  %vm897_vm12 = vweird.f32 %v880_v43 }
 0x66c   :  { %v884_v45 = vmul.f32 0.5, %v883_v44  ;;  %1076 = vmatpush.msrb.mxu3 %v1057_v26 }
 0x66e   :  { %v885_v46 = vsub.f32 1.5, %v884_v45 }
 0x670   :  { %v886_v8 = vmul.f32 %v2274_v40, %v885_v46 }
 0x671   :  { %v2276_v48 = vpop.eup %2275 }
 0x672   :  { %v890_v51 = vsel %vm889_vm10, %v2274_v40, %v886_v8  ;;  %v892_v52 = vmul.f32 %v2276_v48, %v880_v43  ;;  %vm898_vm11 = vweird.f32 %v2276_v48 }
 0x673   :  { %v901_v53 = vmul.f32 %v890_v51, %v877_v49  ;;  %vm899_vm13 = vmor %vm897_vm12, %vm898_vm11  ;;  %vm2069_vm12 = vcmask 254976  }
 0x674   :  { %v893_v54 = vmul.f32 %v2276_v48, %v892_v52 }
 0x675   :  { %2140 = vmatmul.msk.f32.vlgmr.msra.gmra.mxu2 %vm70_vm0, %v901_v53 }
 0x676   :  { %v894_v56 = vmul.f32 0.5, %v893_v54  ;;  %1157 = vmatpush.msra.mxu2 %v1144_v17 }
 0x678   :  { %v895_v57 = vsub.f32 1.5, %v894_v56  ;;  %1158 = vmatpush.msra.mxu2 %v1143_v21 }
 0x67a   :  { %v896_v59 = vmul.f32 %v2276_v48, %v895_v57  ;;  %1159 = vmatpush.msra.mxu2 %v1142_v25 }
 0x67c   :  { %v900_v0 = vsel %vm899_vm13, %v2276_v48, %v896_v59  ;;  %1160 = vmatpush.msra.mxu2 %v1141_v29 }
 0x67d   :  { %v902_v1 = vmul.f32 %v900_v0, %v878_v60 }
 0x67f   :  { %2141 = vmatmul.msk.f32.gmra.mxu2 %vm70_vm0, %v902_v1 }
 0x6f8   :  { %v932_v32 = vpop.f32.mrf.mxu2 }
 0x6f9   :  { %v2679_v33 = vadd.f32 %v932_v32, %v908_v31 }
 0x6fb   :  { %2142 = vmatmul.msk.f32.vlgmr.msra.gmra.mxu3 %vm70_vm0, %v2679_v33  ;;  %2144 = vmatmul.msk.f32.vlgmr.msra.gmra.mxu0 %vm70_vm0, %v2679_v33 }
 0x6fc   :  { %2146 = vmatmul.msk.f32.vlgmr.msrb.gmra.mxu1 %vm70_vm0, %v2679_v33  ;;  %2148 = vmatmul.msk.f32.vlgmr.msrb.gmra.mxu2 %vm70_vm0, %v2679_v33 }
 0x702   :  { %v935_v34 = vpop.f32.mrf.mxu2 }
 0x703   :  { %v2689_v35 = vadd.f32 %v935_v34, %v908_v31 }
 0x705   :  { %2143 = vmatmul.msk.f32.gmra.mxu3 %vm70_vm0, %v2689_v35  ;;  %2145 = vmatmul.msk.f32.gmra.mxu0 %vm70_vm0, %v2689_v35 }
 0x706   :  { %2147 = vmatmul.msk.f32.gmra.mxu1 %vm70_vm0, %v2689_v35  ;;  %2149 = vmatmul.msk.f32.gmra.mxu2 %vm70_vm0, %v2689_v35 }
 0x707   :  { %2158 = vmatpush.xpose.msk.msra.mxu3 %vm70_vm0, %v2689_v35  ;;  %2162 = vmatpush.xpose.msk.msra.mxu0 %vm70_vm0, %v2689_v35 }
 0x708   :  { %2166 = vmatpush.xpose.msk.msrb.mxu1 %vm70_vm0, %v2689_v35  ;;  %2170 = vmatpush.xpose.msk.msrb.mxu2 %vm70_vm0, %v2689_v35 }
 0x70b   :  { %2159 = vmatpush.xpose.msk.msra.mxu3 %vm70_vm0, %v2679_v33  ;;  %2163 = vmatpush.xpose.msk.msra.mxu0 %vm70_vm0, %v2679_v33 }
 0x70c   :  { %2167 = vmatpush.xpose.msk.msrb.mxu1 %vm70_vm0, %v2679_v33  ;;  %2171 = vmatpush.xpose.msk.msrb.mxu2 %vm70_vm0, %v2679_v33 }
 0x70d   :  { %2150 = vmatmul.msk.f32.vlgmr.msrb.gmra.mxu3 %vm70_vm0, %v2679_v33  ;;  %2152 = vmatmul.msk.f32.vlgmr.msrb.gmra.mxu0 %vm70_vm0, %v2679_v33 }
 0x70e   :  { %2154 = vmatmul.msk.f32.vlgmr.msra.gmra.mxu1 %vm70_vm0, %v2679_v33  ;;  %2156 = vmatmul.msk.f32.vlgmr.msra.gmra.mxu2 %vm70_vm0, %v2679_v33 }
 0x715   :  { %2151 = vmatmul.msk.f32.gmra.mxu3 %vm70_vm0, %v2689_v35  ;;  %2153 = vmatmul.msk.f32.gmra.mxu0 %vm70_vm0, %v2689_v35 }
 0x716   :  { %2155 = vmatmul.msk.f32.gmra.mxu1 %vm70_vm0, %v2689_v35  ;;  %2157 = vmatmul.msk.f32.gmra.mxu2 %vm70_vm0, %v2689_v35 }
 0x778   :  { %v994_v36 = vpop.f32.mrf.mxu0 }
 0x779   :  { %v1022_v37 = vpop.f32.mrf.mxu1  ;;  %2164 = vmatmul.msk.f32.vlgmr.msra.gmra.mxu0 %vm70_vm0, %v994_v36 }
 0x77a   :  { %2168 = vmatmul.msk.f32.vlgmr.msrb.gmra.mxu1 %vm70_vm0, %v1022_v37 }
 0x77e   :  { %v966_v38 = vpop.f32.mrf.mxu3 }
 0x77f   :  { %v1050_v39 = vpop.f32.mrf.mxu2  ;;  %2160 = vmatmul.msk.f32.vlgmr.msra.gmra.mxu3 %vm70_vm0, %v966_v38 }
 0x780   :  { %2172 = vmatmul.msk.f32.vlgmr.msrb.gmra.mxu2 %vm70_vm0, %v1050_v39 }
 0x782   :  { %v997_v40 = vpop.f32.mrf.mxu0 }
 0x783   :  { %v1025_v41 = vpop.f32.mrf.mxu1  ;;  %2165 = vmatmul.msk.f32.gmra.mxu0 %vm70_vm0, %v997_v40 }
 0x784   :  { %2169 = vmatmul.msk.f32.gmra.mxu1 %vm70_vm0, %v1025_v41 }
 0x788   :  { %v969_v42 = vpop.f32.mrf.mxu3 }
 0x789   :  { %v1053_v43 = vpop.f32.mrf.mxu2  ;;  %2161 = vmatmul.msk.f32.gmra.mxu3 %vm70_vm0, %v969_v42 }
 0x78a   :  { %2173 = vmatmul.msk.f32.gmra.mxu2 %vm70_vm0, %v1053_v43  ;;  %v1106_v44 = vpop.f32.mrf.mxu0 }
 0x78b   :  { %v1134_v45 = vpop.f32.mrf.mxu1 }
 0x790   :  { %v1078_v46 = vpop.f32.mrf.mxu3 }
 0x791   :  { %v1162_v8 = vpop.f32.mrf.mxu2 }
 0x792   :  { %v1109_v48 = vpop.f32.mrf.mxu0 }
 0x793   :  { %v1137_v49 = vpop.f32.mrf.mxu1  ;;  %1400 = vmatpush.msrb.mxu3 %v1109_v48 }
 0x794   :  { %1458 = vmatpush.msra.mxu1 %v1137_v49 }
 0x795   :  { %1401 = vmatpush.msrb.mxu3 %v1106_v44 }
 0x796   :  { %1459 = vmatpush.msra.mxu1 %v1134_v45 }
 0x798   :  { %v1081_v51 = vpop.f32.mrf.mxu3 }
 0x799   :  { %v1165_v52 = vpop.f32.mrf.mxu2  ;;  %1429 = vmatpush.msrb.mxu0 %v1081_v51 }
 0x79a   :  { %1489 = vmatpush.msra.mxu2 %v1165_v52 }
 0x79b   :  { %1430 = vmatpush.msrb.mxu0 %v1078_v46 }
 0x79c   :  { %1490 = vmatpush.msra.mxu2 %v1162_v8 }
 0x7f6   :  { %v1220_v53 = vpop.f32.mrf.mxu0 }
 0x7f7   :  { %v1286_v54 = vadd.f32 %v1220_v53, %v2500_v55  ;;  %v1249_v56 = vpop.f32.mrf.mxu1 }
 0x7f8   :  { %v1288_v57 = vadd.f32 %v1249_v56, %v2517_v62 }
 0x7f9   :  { %v1298_v59 = vsel %vm420_vm1, %v1286_v54, -inf }
 0x7fa   :  { %v1304_v60 = vsel %vm420_vm1, %v1288_v57, -inf  ;;  %1299 = vmax.xlane.f32.xlu0 %v1298_v59 }
 0x7fb   :  { %1305 = vmax.xlane.f32.xlu1 %v1304_v60 }
 0x800   :  { %v1223_v0 = vpop.f32.mrf.mxu0 }
 0x801   :  { %v1287_v1 = vadd.f32 %v1223_v0, %v2507_v58  ;;  %v1252_v61 = vpop.f32.mrf.mxu1 }
 0x802   :  { %v1289_v3 = vadd.f32 %v1252_v61, %v2530_v5  ;;  %v1191_v6 = vpop.f32.mrf.mxu3 }
 0x803   :  { %v1301_v4 = vsel %vm420_vm1, %v1287_v1, -inf  ;;  %v1278_v7 = vpop.f32.mrf.mxu2  ;;  %v1284_v58 = vadd.f32 %v1191_v6, %v2493_v50 }
 0x804   :  { %v1307_v55 = vsel %vm420_vm1, %v1289_v3, -inf  ;;  %1302 = vmax.xlane.f32.xlu1 %v1301_v4  ;;  %v1290_v62 = vadd.f32 %v1278_v7, %v2523_v2 }
 0x805   :  { %1308 = vmax.xlane.f32.xlu0 %v1307_v55  ;;  %v1292_v63 = vsel %vm420_vm1, %v1284_v58, -inf }
 0x806   :  { %v1310_v9 = vsel %vm420_vm1, %v1290_v62, -inf }
 0x80c   :  { %1311 = vmax.xlane.f32.xlu1 %v1310_v9  ;;  %v1194_v11 = vpop.f32.mrf.mxu3 }
 0x80d   :  { %v1285_v12 = vadd.f32 %v1194_v11, %v2543_v14  ;;  %v1281_v15 = vpop.f32.mrf.mxu2 }
 0x80e   :  { %v1291_v16 = vadd.f32 %v1281_v15, %v2537_v10 }
 0x80f   :  { %v1295_v5 = vsel %vm420_vm1, %v1285_v12, -inf }
 0x810   :  { %1296 = vmax.xlane.f32.xlu2 %v1295_v5  ;;  %v1313_v17 = vsel %vm420_vm1, %v1291_v16, -inf }
 0x814   :  { %1293 = vmax.xlane.f32.xlu1 %v1292_v63 }
 0x81c   :  { %1314 = vmax.xlane.f32.xlu1 %v1313_v17 }
 0x86d   :  { %v1300_v2 = vpop.xlane.xlu0 %1299 }
 0x86e   :  { %v1318_v18 = vsub.f32 %v1286_v54, %v1300_v2  ;;  %v1306_v19 = vpop.xlane.xlu1 %1305 }
 0x86f   :  { %v1320_v10 = vsub.f32 %v1288_v57, %v1306_v19 }
 0x870   :  { %v1328_v20 = vmul.f32 1.442695, %v1318_v18 }
 0x871   :  { %v1332_v31 = vmul.f32 1.442695, %v1320_v10 }
 0x872   :  { %2277 = vpow2.f32 %v1328_v20 }
 0x877   :  { %v1303_v14 = vpop.xlane.xlu1 %1302 }
 0x878   :  { %v2278_v21 = vpop.eup %2277  ;;  %v1319_v50 = vsub.f32 %v1287_v1, %v1303_v14  ;;  %v1309_v34 = vpop.xlane.xlu0 %1308 }
 0x879   :  { %v1346_v22 = vsel %vm420_vm1, %v2278_v21, 0.0  ;;  %v1321_v39 = vsub.f32 %v1289_v3, %v1309_v34 }
 0x87a   :  { %v1330_v23 = vmul.f32 1.442695, %v1319_v50  ;;  %1347 = vadd.xlane.f32.xlu1 %v1346_v22 }
 0x87b   :  { %v1334_v43 = vmul.f32 1.442695, %v1321_v39 }
 0x87c   :  { %2279 = vpow2.f32 %v1330_v23 }
 0x87f   :  { %v1312_v24 = vpop.xlane.xlu1 %1311 }
 0x880   :  { %v1322_v25 = vsub.f32 %v1290_v62, %v1312_v24 }
 0x882   :  { %v2280_v26 = vpop.eup %2279  ;;  %v1336_v27 = vmul.f32 1.442695, %v1322_v25 }
 0x883   :  { %v1297_v28 = vpop.xlane.xlu2 %1296  ;;  %v1349_v29 = vsel %vm420_vm1, %v2280_v26, 0.0 }
 0x884   :  { %2281 = vpow2.f32 %v1336_v27  ;;  %v1317_v30 = vsub.f32 %v1285_v12, %v1297_v28  ;;  %1350 = vadd.xlane.f32.xlu1 %v1349_v29 }
 0x886   :  { %v1326_v32 = vmul.f32 1.442695, %v1317_v30 }
 0x887   :  { %v1294_v36 = vpop.xlane.xlu1 %1293 }
 0x888   :  { %2283 = vpow2.f32 %v1326_v32  ;;  %v1316_v37 = vsub.f32 %v1284_v58, %v1294_v36 }
 0x889   :  { %2285 = vpow2.f32 %v1332_v31 }
 0x88a   :  { %v2282_v38 = vpop.eup %2281  ;;  %v1324_v40 = vmul.f32 1.442695, %v1316_v37 }
 0x88b   :  { %v1358_v41 = vsel %vm420_vm1, %v2282_v38, 0.0 }
 0x88c   :  { %2287 = vpow2.f32 %v1324_v40  ;;  %1359 = vadd.xlane.f32.xlu2 %v1358_v41 }
 0x88d   :  { %2289 = vpow2.f32 %v1334_v43  ;;  %v2188_v43 = vld [vmem:[%s3011_s2 + $0x38] sm:$0xff] }
 0x88e   :  { %v2284_v42 = vpop.eup %2283 }
 0x88f   :  { %v1315_v44 = vpop.xlane.xlu1 %1314  ;;  %v1343_v45 = vsel %vm420_vm1, %v2284_v42, 0.0  ;;  %v2286_v46 = vpop.eup %2285 }
 0x890   :  { %v1323_v8 = vsub.f32 %v1291_v16, %v1315_v44  ;;  %1344 = vadd.xlane.f32.xlu1 %v1343_v45  ;;  %v1352_v52 = vsel %vm420_vm1, %v2286_v46, 0.0  ;;  %v2187_v44 = vld [vmem:[%s3011_s2 + $0x30] sm:$0xff] }
 0x892   :  { %v2288_v48 = vpop.eup %2287  ;;  %v1338_v49 = vmul.f32 1.442695, %v1323_v8 }
 0x893   :  { %v1340_v51 = vsel %vm420_vm1, %v2288_v48, 0.0  ;;  %v2290_v53 = vpop.eup %2289 }
 0x894   :  { %2291 = vpow2.f32 %v1338_v49  ;;  %1341 = vadd.xlane.f32.xlu0 %v1340_v51  ;;  %1353 = vadd.xlane.f32.xlu2 %v1352_v52  ;;  %v1355_v57 = vsel %vm420_vm1, %v2290_v53, 0.0 }
 0x89a   :  { %v2292_v54 = vpop.eup %2291 }
 0x89b   :  { %v1361_v56 = vsel %vm420_vm1, %v2292_v54, 0.0 }
 0x89c   :  { %1362 = vadd.xlane.f32.xlu0 %v1361_v56  ;;  %1356 = vadd.xlane.f32.xlu2 %v1355_v57 }
 0x8ed   :  { %v1348_v59 = vpop.xlane.xlu1 %1347 }
 0x8ee   :  { %2293 = vrcp.f32 %v1348_v59 }
 0x8f4   :  { %v2294_v60 = vpop.eup %2293 }
 0x8f5   :  { %v1374_v0 = vmul.f32 %v2294_v60, %v2278_v21 }
 0x8f7   :  { %2174 = vmatmul.msk.f32.vlgmr.msrb.gmra.mxu3 %vm420_vm1, %v1374_v0  ;;  %v1351_v1 = vpop.xlane.xlu1 %1350 }
 0x8f8   :  { %2295 = vrcp.f32 %v1351_v1 }
 0x8fe   :  { %v2296_v61 = vpop.eup %2295 }
 0x8ff   :  { %v1360_v3 = vpop.xlane.xlu2 %1359  ;;  %v1375_v4 = vmul.f32 %v2296_v61, %v2280_v26 }
 0x900   :  { %2297 = vrcp.f32 %v1360_v3 }
 0x901   :  { %2175 = vmatmul.msk.f32.gmra.mxu3 %vm420_vm1, %v1375_v4 }
 0x903   :  { %v1345_v9 = vpop.xlane.xlu1 %1344 }
 0x906   :  { %v2298_v6 = vpop.eup %2297 }
 0x907   :  { %v1378_v7 = vmul.f32 %v2298_v6, %v2282_v38  ;;  %v1342_v55 = vpop.xlane.xlu0 %1341  ;;  %v1354_v62 = vpop.xlane.xlu2 %1353 }
 0x908   :  { %2299 = vrcp.f32 %v1342_v55 }
 0x909   :  { %2301 = vrcp.f32 %v1354_v62  ;;  %2180 = vmatmul.msk.f32.vlgmr.msra.gmra.mxu2 %vm420_vm1, %v1378_v7 }
 0x90a   :  { %2303 = vrcp.f32 %v1345_v9 }
 0x90e   :  { %v2300_v11 = vpop.eup %2299 }
 0x90f   :  { %v2302_v12 = vpop.eup %2301  ;;  %v1372_v58 = vmul.f32 %v2300_v11, %v2288_v48  ;;  %v1363_v5 = vpop.xlane.xlu0 %1362 }
 0x910   :  { %v1357_v63 = vpop.xlane.xlu2 %1356  ;;  %v1376_v15 = vmul.f32 %v2302_v12, %v2286_v46  ;;  %2305 = vrcp.f32 %v1363_v5  ;;  %v2304_v16 = vpop.eup %2303  ;;  %v2186_v46 = vld [vmem:[%s3011_s2 + $0x28] sm:$0xff] }
 0x911   :  { %2307 = vrcp.f32 %v1357_v63  ;;  %2176 = vmatmul.msk.f32.vlgmr.msrb.gmra.mxu0 %vm420_vm1, %v1372_v58  ;;  %v1373_v18 = vmul.f32 %v2304_v16, %v2284_v42 }
 0x912   :  { %2178 = vmatmul.msk.f32.vlgmr.msra.gmra.mxu1 %vm420_vm1, %v1376_v15 }
 0x916   :  { %v2306_v17 = vpop.eup %2305 }
 0x917   :  { %v2308_v2 = vpop.eup %2307  ;;  %v1379_v19 = vmul.f32 %v2306_v17, %v2292_v54 }
 0x918   :  { %v1377_v20 = vmul.f32 %v2308_v2, %v2290_v53 }
 0x919   :  { %2177 = vmatmul.msk.f32.gmra.mxu0 %vm420_vm1, %v1373_v18  ;;  %2181 = vmatmul.msk.f32.gmra.mxu2 %vm420_vm1, %v1379_v19  ;;  %v2190_v19 = vld [vmem:[%s3011_s2 + $0x48] sm:$0xff] }
 0x91a   :  { %2179 = vmatmul.msk.f32.gmra.mxu1 %vm420_vm1, %v1377_v20  ;;  %v1602_v20 = vperm.slane %v2190_v19, 0 }
 0x97a   :  { %v1403_v14 = vpop.f32.mrf.mxu3 }
 0x984   :  { %v1406_v24 = vpop.f32.mrf.mxu3 }
 0x98c   :  { %v1492_v23 = vpop.f32.mrf.mxu2 }
 0x98e   :  { %v1432_v21 = vpop.f32.mrf.mxu0 }
 0x98f   :  { %v1461_v50 = vpop.f32.mrf.mxu1  ;;  %v1433_v22 = vadd.f32 %v1432_v21, %v1403_v14 }
 0x991   :  { %v1467_v26 = vadd.f32 %v1461_v50, %v1433_v22 }
 0x993   :  { %v1498_v28 = vadd.f32 %v1492_v23, %v1467_v26  ;;  %v2195_v26 = vld [vmem:[%s3012_s3 + $0x38] sm:$0xff] }
 0x995   :  { %v1500_v34 = vadd.f32 %v1498_v28, %v2679_v33 }
 0x996   :  { %v1435_v25 = vpop.f32.mrf.mxu0 }
 0x997   :  { %v1436_v10 = vadd.f32 %v1435_v25, %v1406_v24  ;;  %v1464_v27 = vpop.f32.mrf.mxu1  ;;  %v1531_v37 = vmul.f32 %v1500_v34, %v1500_v34  ;;  %v2196_v25 = vld [vmem:[%s3012_s3 + $0x40] sm:$0xff] }
 0x998   :  { %1663 = vmatpush.msrb.mxu2 %v2196_v25 }
 0x999   :  { %v1468_v29 = vadd.f32 %v1464_v27, %v1436_v10  ;;  %v2194_v10 = vld [vmem:[%s3012_s3 + $0x30] sm:$0xff]  ;;  %v2193_v27 = vld [vmem:[%s3012_s3 + $0x28] sm:$0xff] }
 0x99a   :  { %1664 = vmatpush.msrb.mxu2 %v2195_v26 }
 0x99c   :  { %v1495_v30 = vpop.f32.mrf.mxu2  ;;  %1665 = vmatpush.msrb.mxu2 %v2194_v10 }
 0x99d   :  { %v1499_v31 = vadd.f32 %v1495_v30, %v1468_v29  ;;  %v2197_v30 = vld [vmem:[%s3012_s3 + $0x48] sm:$0xff] }
 0x99e   :  { %1666 = vmatpush.msrb.mxu2 %v2193_v27 }
 0x99f   :  { %v2772_v32 = vadd.f32 %v1499_v31, %v2689_v35 }
 0x9a1   :  { %v1532_v36 = vmul.f32 %v2772_v32, %v2772_v32  ;;  %1516 = vmatpush.msra.mxu3 %v2772_v32 }
 0x9a3   :  { %1517 = vmatpush.msra.mxu3 %v1500_v34  ;;  %1547 = vmatpush.msra.mxu0 %v1532_v36 }
 0x9a4   :  { %2182 = vmatmul.msk.f32.vlgmr.msra.gmra.mxu3 %vm420_vm1, %v2578_v47 }
 0x9a5   :  { %1548 = vmatpush.msra.mxu0 %v1531_v37 }
 0x9a6   :  { %2184 = vmatmul.msk.f32.vlgmr.msra.gmra.mxu0 %vm420_vm1, %v2578_v47 }
 0x9ac   :  { %2183 = vmatmul.msk.f32.gmra.mxu3 %vm420_vm1, %v2590_v13 }
 0x9ae   :  { %2185 = vmatmul.msk.f32.gmra.mxu0 %vm420_vm1, %v2590_v13  ;;  %v2189_v13 = vld [vmem:[%s3011_s2 + $0x40] sm:$0xff] }
 0x9af   :  { %1621 = vmatpush.msrb.mxu1 %v2189_v13 }
 0x9b1   :  { %1622 = vmatpush.msrb.mxu1 %v2188_v43 }
 0x9b3   :  { %1623 = vmatpush.msrb.mxu1 %v2187_v44 }
 0x9b5   :  { %1624 = vmatpush.msrb.mxu1 %v2186_v46 }
 0xa23   :  { %v1550_v33 = vpop.f32.mrf.mxu0 }
 0xa24   :  { %v1556_v35 = vsel %vm70_vm0, %v1550_v33, 0.0 }
 0xa25   :  { %1557 = vadd.xlane.f32.xlu1 %v1556_v35 }
 0xa27   :  { %v1519_v38 = vpop.f32.mrf.mxu3 }
 0xa28   :  { %v1525_v39 = vsel %vm70_vm0, %v1519_v38, 0.0 }
 0xa29   :  { %1526 = vadd.xlane.f32.xlu0 %v1525_v39 }
 0xa2b   :  { %v1553_v40 = vpop.f32.mrf.mxu0 }
 0xa2c   :  { %v1559_v41 = vsel %vm70_vm0, %v1553_v40, 0.0  ;;  %v2317_v40 = vld [vmem:[%s3014_s5 + $0x40] sm:$0xff] }
 0xa2f   :  { %v1522_v42 = vpop.f32.mrf.mxu3 }
 0xa30   :  { %v1528_v47 = vsel %vm70_vm0, %v1522_v42, 0.0 }
 0xa31   :  { %1529 = vadd.xlane.f32.xlu2 %v1528_v47  ;;  %1560 = vadd.xlane.f32.xlu0 %v1559_v41  ;;  %v2318_v41 = vld [vmem:[%s3014_s5 + $0x48] sm:$0xff] }
 0xa98   :  { %v1558_v45 = vpop.xlane.xlu1 %1557 }
 0xa99   :  { %v1564_v49 = vmul.f32 0.00390625, %v1558_v45 }
 0xa9c   :  { %v1527_v8 = vpop.xlane.xlu0 %1526 }
 0xa9d   :  { %v1562_v48 = vmul.f32 0.00390625, %v1527_v8 }
 0xa9f   :  { %v1566_v51 = vmul.f32 %v1562_v48, %v1562_v48  ;;  %v1570_v11 = vsub.f32 %v1500_v34, %v1562_v48 }
 0xaa1   :  { %v1568_v52 = vsub.f32 %v1564_v49, %v1566_v51  ;;  %v2207_v49 = vld [vmem:[%s3013_s4 + $0x40] sm:$0xff]  ;;  %v2206_v51 = vld [vmem:[%s3013_s4 + $0x38] sm:$0xff] }
 0xaa2   :  { %1795 = vmatpush.msra.mxu1 %v2207_v49  ;;  %v1820_v49 = vld [vmem:[%s3015_s6 + $0x70] sm:$0xff] }
 0xaa3   :  { %v1572_v53 = vadd.f32 1e-05, %v1568_v52  ;;  %v2205_v52 = vld [vmem:[%s3013_s4 + $0x30] sm:$0xff] }
 0xaa4   :  { %v1530_v54 = vpop.xlane.xlu2 %1529  ;;  %v1561_v56 = vpop.xlane.xlu0 %1560  ;;  %1796 = vmatpush.msra.mxu1 %v2206_v51  ;;  %v1819_v51 = vld [vmem:[%s3015_s6 + $0x68] sm:$0xff] }
 0xaa5   :  { %2309 = vrsqrt.f32 %v1572_v53  ;;  %v1563_v57 = vmul.f32 0.00390625, %v1530_v54  ;;  %v1565_v59 = vmul.f32 0.00390625, %v1561_v56  ;;  %vm1580_vm15 = vweird.f32 %v1572_v53 }
 0xaa6   :  { %1797 = vmatpush.msra.mxu1 %v2205_v52 }
 0xaa7   :  { %v1567_v60 = vmul.f32 %v1563_v57, %v1563_v57  ;;  %v1571_v17 = vsub.f32 %v2772_v32, %v1563_v57  ;;  %v1640_v32 = vperm.slane %v2197_v30, 0  ;;  %v50_v30 = vld [vmem:[%s3014_s5 + $0x10] sm:$0xff] }
 0xaa9   :  { %v1569_v0 = vsub.f32 %v1565_v59, %v1567_v60 }
 0xaab   :  { %v2310_v1 = vpop.eup %2309  ;;  %v1573_v61 = vadd.f32 1e-05, %v1569_v0 }
 0xaac   :  { %v1575_v3 = vmul.f32 %v2310_v1, %v1572_v53  ;;  %vm1581_vm14 = vweird.f32 %v2310_v1  ;;  %v2204_v53 = vld [vmem:[%s3013_s4 + $0x28] sm:$0xff] }
 0xaad   :  { %2311 = vrsqrt.f32 %v1573_v61  ;;  %vm1582_vm2 = vmor %vm1580_vm15, %vm1581_vm14  ;;  %vm1590_vm3 = vweird.f32 %v1573_v61  ;;  %1798 = vmatpush.msra.mxu1 %v2204_v53  ;;  %v1818_v53 = vld [vmem:[%s3015_s6 + $0x60] sm:$0xff] }
 0xaae   :  { %v1576_v4 = vmul.f32 %v2310_v1, %v1575_v3 }
 0xab0   :  { %v1577_v6 = vmul.f32 0.5, %v1576_v4 }
 0xab2   :  { %v1578_v7 = vsub.f32 1.5, %v1577_v6 }
 0xab3   :  { %v2312_v55 = vpop.eup %2311 }
 0xab4   :  { %v1579_v62 = vmul.f32 %v2310_v1, %v1578_v7  ;;  %v1585_v9 = vmul.f32 %v2312_v55, %v1573_v61  ;;  %vm1591_vm4 = vweird.f32 %v2312_v55 }
 0xab5   :  { %vm1592_vm5 = vmor %vm1590_vm3, %vm1591_vm4 }
 0xab6   :  { %v1583_v12 = vsel %vm1582_vm2, %v2310_v1, %v1579_v62  ;;  %v1586_v58 = vmul.f32 %v2312_v55, %v1585_v9 }
 0xab7   :  { %v1594_v5 = vmul.f32 %v1583_v12, %v1570_v11 }
 0xab8   :  { %v1587_v63 = vmul.f32 0.5, %v1586_v58 }
 0xab9   :  { %2191 = vmatmul.msk.f32.vlgmr.msrb.gmra.mxu1 %vm70_vm0, %v1594_v5 }
 0xaba   :  { %v1588_v15 = vsub.f32 1.5, %v1587_v63 }
 0xabc   :  { %v1589_v16 = vmul.f32 %v2312_v55, %v1588_v15 }
 0xabe   :  { %v1593_v2 = vsel %vm1592_vm5, %v2312_v55, %v1589_v16 }
 0xabf   :  { %v1595_v18 = vmul.f32 %v1593_v2, %v1571_v17 }
 0xac1   :  { %2192 = vmatmul.msk.f32.gmra.mxu1 %vm70_vm0, %v1595_v18 }
 0xb36   :  { %v1626_v14 = vpop.f32.mrf.mxu1 }
 0xb37   :  { %v1627_v21 = vadd.f32 %v1626_v14, %v1602_v20 }
 0xb39   :  { %v1632_v50 = vmax.f32 %v1627_v21, 0.0 }
 0xb3b   :  { %1643 = vrot.lane.b32.xlu1 %v1632_v50, %s2374_s28 }
 0xb3e   :  { %v1629_v22 = vpop.f32.mrf.mxu1 }
 0xb3f   :  { %v1630_v23 = vadd.f32 %v1629_v22, %v1602_v20 }
 0xb41   :  { %v1633_v24 = vmax.f32 %v1630_v23, 0.0 }
 0xb43   :  { %1645 = vrot.lane.b32.xlu2 %v1633_v24, %s2374_s28  ;;  %v2208_v24 = vld [vmem:[%s3013_s4 + $0x48] sm:$0xff] }
 0xb44   :  { %v1776_v25 = vperm.slane %v2208_v24, 0 }
 0xb9d   :  { %v1646_v29 = vpop.permute.xlu2 %1645 }
 0xbad   :  { %v1644_v28 = vpop.permute.xlu1 %1643 }
 0xbae   :  { %2198 = vmatmul.msk.f32.vlgmr.msrb.gmra.mxu2 %vm70_vm0, %v1644_v28  ;;  %v48_v28 = vld [vmem:[%s3014_s5] sm:$0xff] }
 0xbb6   :  { %2199 = vmatmul.msk.f32.gmra.mxu2 %vm70_vm0, %v1646_v29  ;;  %v49_v29 = vld [vmem:[%s3014_s5 + $0x8] sm:$0xff] }
 0xc31   :  { %v1668_v31 = vpop.f32.mrf.mxu2 }
 0xc32   :  { %v1669_v34 = vadd.f32 %v1668_v31, %v1640_v32  ;;  %v51_v31 = vld [vmem:[%s3014_s5 + $0x18] sm:$0xff] }
 0xc34   :  { %v2827_v33 = vadd.f32 %v1669_v34, %v1627_v21  ;;  %v53_v34 = vld [vmem:[%s3014_s5 + $0x28] sm:$0xff] }
 0xc36   :  { %v1705_v39 = vmul.f32 %v2827_v33, %v2827_v33 }
 0xc39   :  { %v1671_v36 = vpop.f32.mrf.mxu2 }
 0xc3a   :  { %v1672_v37 = vadd.f32 %v1671_v36, %v1640_v32  ;;  %v52_v32 = vld [vmem:[%s3014_s5 + $0x20] sm:$0xff]  ;;  %v54_v36 = vld [vmem:[%s3014_s5 + $0x30] sm:$0xff] }
 0xc3c   :  { %v2829_v35 = vadd.f32 %v1672_v37, %v1630_v23  ;;  %v55_v37 = vld [vmem:[%s3014_s5 + $0x38] sm:$0xff] }
 0xc3e   :  { %v1706_v38 = vmul.f32 %v2829_v35, %v2829_v35  ;;  %1690 = vmatpush.msrb.mxu3 %v2829_v35 }
 0xc40   :  { %1691 = vmatpush.msrb.mxu3 %v2827_v33  ;;  %1721 = vmatpush.msrb.mxu0 %v1706_v38  ;;  %v1807_v38 = vld [vmem:[%s3015_s6 + $0x8] sm:$0xff] }
 0xc41   :  { %2200 = vmatmul.msk.f32.vlgmr.msrb.gmra.mxu3 %vm420_vm1, %v2317_v40 }
 0xc42   :  { %1722 = vmatpush.msrb.mxu0 %v1705_v39  ;;  %v1806_v39 = vld [vmem:[%s3015_s6] sm:$0xff] }
 0xc43   :  { %2202 = vmatmul.msk.f32.vlgmr.msrb.gmra.mxu0 %vm420_vm1, %v2317_v40  ;;  %v1813_v40 = vld [vmem:[%s3015_s6 + $0x38] sm:$0xff] }
 0xc44   :  { %1938 = vmatpush.msra.mxu0 %v1813_v40 }
 0xc49   :  { %2201 = vmatmul.msk.f32.gmra.mxu3 %vm420_vm1, %v2318_v41 }
 0xc4b   :  { %2203 = vmatmul.msk.f32.gmra.mxu0 %vm420_vm1, %v2318_v41  ;;  %v1812_v41 = vld [vmem:[%s3015_s6 + $0x30] sm:$0xff] }
 0xc4c   :  { %1939 = vmatpush.msra.mxu0 %v1812_v41 }
 0xcc0   :  { %v1724_v42 = vpop.f32.mrf.mxu0 }
 0xcc1   :  { %v1730_v47 = vsel %vm70_vm0, %v1724_v42, 0.0  ;;  %v1811_v42 = vld [vmem:[%s3015_s6 + $0x28] sm:$0xff] }
 0xcc2   :  { %1731 = vadd.xlane.f32.xlu0 %v1730_v47  ;;  %v1810_v47 = vld [vmem:[%s3015_s6 + $0x20] sm:$0xff]  ;;  %1940 = vmatpush.msra.mxu0 %v1811_v42 }
 0xcc4   :  { %v1693_v13 = vpop.f32.mrf.mxu3  ;;  %1941 = vmatpush.msra.mxu0 %v1810_v47  ;;  %v2044_v47 = vld [vmem:[%s3016_s7 + $0x60] sm:$0xff] }
 0xcc5   :  { %v1699_v43 = vsel %vm70_vm0, %v1693_v13, 0.0  ;;  %v1817_v13 = vld [vmem:[%s3015_s6 + $0x58] sm:$0xff] }
 0xcc6   :  { %1969 = vmatpush.msrb.mxu1 %v1817_v13  ;;  %v2045_v13 = vperm.slane %v2044_v47, 0 }
 0xcc8   :  { %v1727_v44 = vpop.f32.mrf.mxu0 }
 0xcc9   :  { %v1733_v45 = vsel %vm70_vm0, %v1727_v44, 0.0  ;;  %v1815_v44 = vld [vmem:[%s3015_s6 + $0x48] sm:$0xff] }
 0xcca   :  { %1700 = vadd.xlane.f32.xlu0 %v1699_v43  ;;  %1734 = vadd.xlane.f32.xlu1 %v1733_v45  ;;  %v1816_v43 = vld [vmem:[%s3015_s6 + $0x50] sm:$0xff] }
 0xccb   :  { %1970 = vmatpush.msrb.mxu1 %v1816_v43 }
 0xccc   :  { %v1696_v46 = vpop.f32.mrf.mxu3 }
 0xccd   :  { %v1702_v8 = vsel %vm70_vm0, %v1696_v46, 0.0  ;;  %1971 = vmatpush.msrb.mxu1 %v1815_v44  ;;  %v1814_v46 = vld [vmem:[%s3015_s6 + $0x40] sm:$0xff] }
 0xccf   :  { %1972 = vmatpush.msrb.mxu1 %v1814_v46 }
 0xcd2   :  { %1703 = vadd.xlane.f32.xlu0 %v1702_v8 }
 0xd35   :  { %v1732_v48 = vpop.xlane.xlu0 %1731 }
 0xd36   :  { %v1738_v57 = vmul.f32 0.00390625, %v1732_v48  ;;  %v1821_v48 = vld [vmem:[%s3015_s6 + $0x78] sm:$0xff] }
 0xd3d   :  { %v1701_v54 = vpop.xlane.xlu0 %1700  ;;  %v1735_v0 = vpop.xlane.xlu1 %1734 }
 0xd3e   :  { %v1736_v56 = vmul.f32 0.00390625, %v1701_v54  ;;  %v1739_v4 = vmul.f32 0.00390625, %v1735_v0  ;;  %v2043_v0 = vld [vmem:[%s3016_s7 + $0x58] sm:$0xff] }
 0xd3f   :  { %2053 = vmatpush.msrb.mxu0 %v2043_v0 }
 0xd40   :  { %v1740_v59 = vmul.f32 %v1736_v56, %v1736_v56  ;;  %v1744_v16 = vsub.f32 %v2827_v33, %v1736_v56  ;;  %v1809_v33 = vld [vmem:[%s3015_s6 + $0x18] sm:$0xff] }
 0xd41   :  { %1907 = vmatpush.msra.mxu3 %v1809_v33 }
 0xd42   :  { %v1742_v60 = vsub.f32 %v1738_v57, %v1740_v59 }
 0xd44   :  { %v1746_v1 = vadd.f32 1e-05, %v1742_v60 }
 0xd45   :  { %v1704_v61 = vpop.xlane.xlu0 %1703 }
 0xd46   :  { %2313 = vrsqrt.f32 %v1746_v1  ;;  %v1737_v3 = vmul.f32 0.00390625, %v1704_v61  ;;  %vm1754_vm7 = vweird.f32 %v1746_v1  ;;  %v2041_v61 = vld [vmem:[%s3016_s7 + $0x48] sm:$0xff] }
 0xd48   :  { %v1741_v6 = vmul.f32 %v1737_v3, %v1737_v3  ;;  %v1745_v21 = vsub.f32 %v2829_v35, %v1737_v3  ;;  %v1808_v35 = vld [vmem:[%s3015_s6 + $0x10] sm:$0xff]  ;;  %v2040_v3 = vld [vmem:[%s3016_s7 + $0x40] sm:$0xff] }
 0xd49   :  { %1908 = vmatpush.msra.mxu3 %v1808_v35 }
 0xd4a   :  { %v1743_v7 = vsub.f32 %v1739_v4, %v1741_v6  ;;  %v2039_v6 = vld [vmem:[%s3016_s7 + $0x38] sm:$0xff] }
 0xd4b   :  { %1909 = vmatpush.msra.mxu3 %v1807_v38 }
 0xd4c   :  { %v2314_v55 = vpop.eup %2313  ;;  %v1747_v62 = vadd.f32 1e-05, %v1743_v7  ;;  %v2038_v7 = vld [vmem:[%s3016_s7 + $0x30] sm:$0xff] }
 0xd4d   :  { %v1749_v9 = vmul.f32 %v2314_v55, %v1746_v1  ;;  %vm1755_vm6 = vweird.f32 %v2314_v55  ;;  %1910 = vmatpush.msra.mxu3 %v1806_v39  ;;  %v2042_v1 = vld [vmem:[%s3016_s7 + $0x50] sm:$0xff] }
 0xd4e   :  { %2315 = vrsqrt.f32 %v1747_v62  ;;  %vm1756_vm8 = vmor %vm1754_vm7, %vm1755_vm6  ;;  %vm1764_vm10 = vweird.f32 %v1747_v62  ;;  %2054 = vmatpush.msrb.mxu0 %v2042_v1 }
 0xd4f   :  { %v1750_v11 = vmul.f32 %v2314_v55, %v1749_v9  ;;  %2000 = vmatpush.msrb.mxu3 %v1821_v48  ;;  %v2035_v9 = vld [vmem:[%s3016_s7 + $0x18] sm:$0xff] }
 0xd50   :  { %2055 = vmatpush.msrb.mxu0 %v2041_v61 }
 0xd51   :  { %v1751_v12 = vmul.f32 0.5, %v1750_v11  ;;  %2001 = vmatpush.msrb.mxu3 %v1820_v49  ;;  %v1822_v11 = vld [vmem:[%s3015_s6 + $0x80] sm:$0xff] }
 0xd52   :  { %2056 = vmatpush.msrb.mxu0 %v2040_v3 }
 0xd53   :  { %v1752_v58 = vsub.f32 1.5, %v1751_v12  ;;  %2002 = vmatpush.msrb.mxu3 %v1819_v51 }
 0xd54   :  { %v2316_v5 = vpop.eup %2315  ;;  %2057 = vmatpush.msrb.mxu0 %v2039_v6 }
 0xd55   :  { %v1753_v63 = vmul.f32 %v2314_v55, %v1752_v58  ;;  %v1759_v15 = vmul.f32 %v2316_v5, %v1747_v62  ;;  %vm1765_vm9 = vweird.f32 %v2316_v5  ;;  %2003 = vmatpush.msrb.mxu3 %v1818_v53  ;;  %v2036_v62 = vld [vmem:[%s3016_s7 + $0x20] sm:$0xff] }
 0xd56   :  { %vm1766_vm11 = vmor %vm1764_vm10, %vm1765_vm9  ;;  %2058 = vmatpush.msrb.mxu0 %v2038_v7 }
 0xd57   :  { %v1757_v17 = vsel %vm1756_vm8, %v2314_v55, %v1753_v63  ;;  %v1760_v2 = vmul.f32 %v2316_v5, %v1759_v15  ;;  %v2037_v55 = vld [vmem:[%s3016_s7 + $0x28] sm:$0xff] }
 0xd58   :  { %v1768_v18 = vmul.f32 %v1757_v17, %v1744_v16  ;;  %2059 = vmatpush.msrb.mxu0 %v2037_v55  ;;  %v2033_v63 = vld [vmem:[%s3016_s7 + $0x8] sm:$0xff]  ;;  %v2032_v16 = vld [vmem:[%s3016_s7] sm:$0xff] }
 0xd59   :  { %v1761_v19 = vmul.f32 0.5, %v1760_v2 }
 0xd5a   :  { %2209 = vmatmul.msk.f32.vlgmr.msra.gmra.mxu1 %vm70_vm0, %v1768_v18  ;;  %2060 = vmatpush.msrb.mxu0 %v2036_v62 }
 0xd5b   :  { %v1762_v20 = vsub.f32 1.5, %v1761_v19  ;;  %v1823_v19 = vld [vmem:[%s3015_s6 + $0x88] sm:$0xff] }
 0xd5c   :  { %2061 = vmatpush.msrb.mxu0 %v2035_v9 }
 0xd5d   :  { %v1763_v14 = vmul.f32 %v2316_v5, %v1762_v20 }
 0xd5f   :  { %v1767_v50 = vsel %vm1766_vm11, %v2316_v5, %v1763_v14  ;;  %v2034_v5 = vld [vmem:[%s3016_s7 + $0x10] sm:$0xff] }
 0xd60   :  { %v1769_v22 = vmul.f32 %v1767_v50, %v1745_v21  ;;  %2062 = vmatpush.msrb.mxu0 %v2034_v5 }
 0xd62   :  { %2210 = vmatmul.msk.f32.gmra.mxu1 %vm70_vm0, %v1769_v22  ;;  %2063 = vmatpush.msrb.mxu0 %v2033_v63 }
 0xd64   :  { %2064 = vmatpush.msrb.mxu0 %v2032_v16 }
 0xdd7   :  { %v1800_v23 = vpop.f32.mrf.mxu1 }
 0xdd8   :  { %v1801_v27 = vadd.f32 %v1800_v23, %v1776_v25 }
 0xddf   :  { %v1803_v26 = vpop.f32.mrf.mxu1 }
 0xde0   :  { %v1804_v10 = vadd.f32 %v1803_v26, %v1776_v25 }
 0xde2   :  { %1862 = vmatpush.msra.mxu2 %v1804_v10 }
 0xde4   :  { %1863 = vmatpush.msra.mxu2 %v1801_v27 }
 0xde5   :  { %2211 = vmatmul.msk.f32.vlgmr.msra.gmra.mxu2 %vm420_vm1, %v48_v28 }
 0xded   :  { %2212 = vmatmul.msk.f32.gmra.mxu2 %vm420_vm1, %v49_v29 }
 0xdf5   :  { %2213 = vmatmul.msk.f32.gmra.mxu2 %vm420_vm1, %v50_v30 }
 0xdfd   :  { %2214 = vmatmul.msk.f32.gmra.mxu2 %vm420_vm1, %v51_v31 }
 0xe05   :  { %2215 = vmatmul.msk.f32.gmra.mxu2 %vm420_vm1, %v52_v32 }
 0xe0d   :  { %2216 = vmatmul.msk.f32.gmra.mxu2 %vm420_vm1, %v53_v34 }
 0xe15   :  { %2217 = vmatmul.msk.f32.gmra.mxu2 %vm420_vm1, %v54_v36 }
 0xe1d   :  { %2218 = vmatmul.msk.f32.gmra.mxu2 %vm420_vm1, %v55_v37  ;;  %vm2030_vm1 = vcmask 1040384  }
 0xe68   :  { %v1865_v45 = vpop.f32.mrf.mxu2 }
 0xe69   :  { %2219 = vmatmul.msk.f32.vlgmr.msra.gmra.mxu3 %vm70_vm0, %v1865_v45 }
 0xe70   :  { %v1868_v8 = vpop.f32.mrf.mxu2 }
 0xe71   :  { %2220 = vmatmul.msk.f32.gmra.mxu3 %vm70_vm0, %v1868_v8 }
 0xe78   :  { %v1871_v52 = vpop.f32.mrf.mxu2 }
 0xe79   :  { %2221 = vmatmul.msk.f32.vlgmr.msra.gmra.mxu0 %vm70_vm0, %v1871_v52 }
 0xe80   :  { %v1874_v54 = vpop.f32.mrf.mxu2 }
 0xe81   :  { %2222 = vmatmul.msk.f32.gmra.mxu0 %vm70_vm0, %v1874_v54 }
 0xe88   :  { %v1877_v56 = vpop.f32.mrf.mxu2 }
 0xe89   :  { %2223 = vmatmul.msk.f32.vlgmr.msrb.gmra.mxu1 %vm70_vm0, %v1877_v56 }
 0xe90   :  { %v1880_v57 = vpop.f32.mrf.mxu2 }
 0xe91   :  { %2224 = vmatmul.msk.f32.gmra.mxu1 %vm70_vm0, %v1880_v57 }
 0xe98   :  { %v1883_v59 = vpop.f32.mrf.mxu2 }
 0xe99   :  { %2225 = vmatmul.msk.f32.vlgmr.msrb.gmra.mxu3 %vm70_vm0, %v1883_v59 }
 0xea0   :  { %v1886_v60 = vpop.f32.mrf.mxu2 }
 0xea1   :  { %2226 = vmatmul.msk.f32.gmra.mxu3 %vm70_vm0, %v1886_v60  ;;  %vm2015_vm0 = vcmask 785408  }
 0xeec   :  { %v1912_v4 = vpop.f32.mrf.mxu3 }
 0xeed   :  { %v1918_v17 = vadd.f32 %v1912_v4, %v1822_v11 }
 0xef4   :  { %v1915_v58 = vpop.f32.mrf.mxu3 }
 0xef5   :  { %v1919_v50 = vadd.f32 %v1915_v58, %v1823_v19 }
 0xef6   :  { %v1943_v12 = vpop.f32.mrf.mxu0 }
 0xef7   :  { %v1949_v2 = vadd.f32 %v1943_v12, %v1918_v17 }
 0xefe   :  { %v1946_v21 = vpop.f32.mrf.mxu0 }
 0xeff   :  { %v1950_v24 = vadd.f32 %v1946_v21, %v1919_v50 }
 0xf06   :  { %v1974_v15 = vpop.f32.mrf.mxu1 }
 0xf07   :  { %v1980_v18 = vadd.f32 %v1974_v15, %v1949_v2 }
 0xf0e   :  { %v1977_v23 = vpop.f32.mrf.mxu1 }
 0xf0f   :  { %v1981_v10 = vadd.f32 %v1977_v23, %v1950_v24 }
 0xf1c   :  { %v2005_v20 = vpop.f32.mrf.mxu3 }
 0xf1d   :  { %v2011_v14 = vadd.f32 %v2005_v20, %v1980_v18 }
 0xf1f   :  { %v2013_v22 = vmax.f32 %v2011_v14, 0.0 }
 0xf21   :  { %v2016_v25 = vsel %vm2015_vm0, %v2013_v22, -inf }
 0xf22   :  { %v2017_v26 = vrot.slane %v2016_v25, 4 }
 0xf24   :  { %v2018_v27 = vmax.f32 %v2016_v25, %v2017_v26  ;;  %v2008_v28 = vpop.f32.mrf.mxu3 }
 0xf25   :  { %v2012_v29 = vadd.f32 %v2008_v28, %v1981_v10 }
 0xf26   :  { %v2019_v31 = vrot.slane %v2018_v27, 2 }
 0xf27   :  { %v2014_v30 = vmax.f32 %v2012_v29, 0.0 }
 0xf28   :  { %v2020_v36 = vmax.f32 %v2018_v27, %v2019_v31 }
 0xf29   :  { %v2023_v32 = vsel %vm2015_vm0, %v2014_v30, -inf }
 0xf2a   :  { %v2024_v34 = vrot.slane %v2023_v32, 4  ;;  %v2021_v35 = vrot.slane %v2020_v36, 1 }
 0xf2c   :  { %v2025_v37 = vmax.f32 %v2023_v32, %v2024_v34  ;;  %v2022_v40 = vmax.f32 %v2020_v36, %v2021_v35 }
 0xf2e   :  { %v2026_v33 = vrot.slane %v2025_v37, 2 }
 0xf30   :  { %v2027_v38 = vmax.f32 %v2025_v37, %v2026_v33 }
 0xf32   :  { %v2028_v39 = vrot.slane %v2027_v38, 1 }
 0xf34   :  { %v2029_v41 = vmax.f32 %v2027_v38, %v2028_v39 }
 0xf36   :  { %v2031_v42 = vsel %vm2030_vm1, %v2022_v40, %v2029_v41 }
 0xf37   :  { %2227 = vmatmul.msk.f32.vlgmr.msrb.gmra.mxu0 %vm2015_vm0, %v2031_v42 }
 0xfb4   :  { %v2066_v43 = vpop.f32.mrf.mxu0 }
 0xfb5   :  { %v2067_v44 = vadd.f32 %v2066_v43, %v2045_v13 }
 0xfb7   :  { %2070 = vst.msk [vmem:[#allocation5] sm:$0x3] %vm2069_vm12, %v2067_v44 }
 0xfb8   :  { %2081 = dma.vmem_to_hbm [thread:$0]  %s2077_s20, 32, %s2079_s22, [#allocation4]  }
 0xfb9   :  { %2369 = dma.done.wait [#allocation4], 32  }
 0xfba   :  { %2370 = vsyncadd [#allocation4], 4294967264 }
 0xfbb   :  { %2086 = vsyncpa [#allocation3], 1 }
 0xfbc   :  { %2087 = vsyncpa [#allocation4], 1 }

</bundles_post_ra>
